<compile_context>
chip_gen: v7x
topology: tpu7x:2x2x1
jax: 0.10.0
libtpu: 0.0.40
codegen_flags: <defaults>
</compile_context>

<pallas_src>
import math
import functools

import jax
import jax.numpy as jnp
from jax.experimental import pallas as pl
from jax.experimental.pallas import tpu as pltpu


def _encoder_kernel(src_ref,
                    wq_ref, bq_ref, wk_ref, bk_ref, wv_ref, bv_ref,
                    wo_ref, bo_ref,
                    w1_ref, b1_ref, w2_ref, b2_ref,
                    g1_ref, be1_ref, g2_ref, be2_ref,
                    out_ref,
                    k_cache_ref, v_cache_ref,
                    *, d_model, nhead, eps, tq, ff_chunk, n_ff_chunks):
    qt = pl.program_id(1)

    # ---- K/V projections of the FULL sequence, computed once per batch elem ----
    @pl.when(qt == 0)
    def _compute_kv():
        xs = src_ref[...].astype(jnp.bfloat16)                         # (S, D)
        k = jnp.dot(xs, wk_ref[...], preferred_element_type=jnp.float32) + bk_ref[...]
        v = jnp.dot(xs, wv_ref[...], preferred_element_type=jnp.float32) + bv_ref[...]
        k_cache_ref[...] = k.astype(jnp.bfloat16)
        v_cache_ref[...] = v.astype(jnp.bfloat16)

    # ---- query tile ----
    q_start = pl.multiple_of(qt * tq, tq)
    x = src_ref[pl.ds(q_start, tq), :].astype(jnp.float32)             # (TQ, D)

    # Q projection; fold the attention scale into q (cheaper than scaling (TQ,S)).
    scale = 1.0 / math.sqrt(d_model / nhead)
    q = jnp.dot(x.astype(jnp.bfloat16), wq_ref[...],
                preferred_element_type=jnp.float32) + bq_ref[...]
    q = q * scale

    # scores = q @ K^T without materializing a transpose: contract last dims.
    scores = jax.lax.dot_general(
        q.astype(jnp.bfloat16), k_cache_ref[...],
        (((1,), (1,)), ((), ())),
        preferred_element_type=jnp.float32)                            # (TQ, S)

    # softmax in f32; denominator reciprocal goes to the EUP slot.
    scores = scores - jnp.max(scores, axis=-1, keepdims=True)
    p = jnp.exp(scores)
    p = p * pl.reciprocal(jnp.sum(p, axis=-1, keepdims=True), approx=True)

    attn = jnp.dot(p.astype(jnp.bfloat16), v_cache_ref[...],
                   preferred_element_type=jnp.float32)                 # (TQ, D)
    attn = jnp.dot(attn.astype(jnp.bfloat16), wo_ref[...],
                   preferred_element_type=jnp.float32) + bo_ref[...]

    # ---- residual + LayerNorm1 (dropout1 == identity) ----
    x = x + attn
    mu = jnp.mean(x, axis=-1, keepdims=True)
    var = jnp.mean((x - mu) ** 2, axis=-1, keepdims=True)
    x = (x - mu) * jax.lax.rsqrt(var + eps) * g1_ref[...] + be1_ref[...]

    # ---- Feed-forward, chunked over the FF dim (no full (TQ, FF) live slab) ----
    x_bf = x.astype(jnp.bfloat16)
    if n_ff_chunks == 1:
        h = jnp.dot(x_bf, w1_ref[...], preferred_element_type=jnp.float32) + b1_ref[...]
        h = jnp.maximum(h, 0.0)                                        # dropout == identity
        ff = jnp.dot(h.astype(jnp.bfloat16), w2_ref[...],
                     preferred_element_type=jnp.float32)
    else:
        def ff_body(c, acc):
            start = pl.multiple_of(c * ff_chunk, ff_chunk)
            h = jnp.dot(x_bf, w1_ref[:, pl.ds(start, ff_chunk)],
                        preferred_element_type=jnp.float32) + b1_ref[:, pl.ds(start, ff_chunk)]
            h = jnp.maximum(h, 0.0)
            return acc + jnp.dot(h.astype(jnp.bfloat16),
                                 w2_ref[pl.ds(start, ff_chunk), :],
                                 preferred_element_type=jnp.float32)
        # Short fixed trip-count: unroll so the LLO scheduler sees the whole body.
        ff = jax.lax.fori_loop(0, n_ff_chunks, ff_body,
                               jnp.zeros((tq, d_model), jnp.float32),
                               unroll=True)
    ff = ff + b2_ref[...]

    # ---- residual + LayerNorm2 (dropout2 == identity) ----
    x = x + ff
    mu = jnp.mean(x, axis=-1, keepdims=True)
    var = jnp.mean((x - mu) ** 2, axis=-1, keepdims=True)
    x = (x - mu) * jax.lax.rsqrt(var + eps) * g2_ref[...] + be2_ref[...]

    out_ref[...] = x.astype(out_ref.dtype)


def transformer_encoder_layer(src, params, *, nhead, tq=256, ff_chunk=512,
                              vmem_limit_bytes=64 * 1024 * 1024):
    """src: (B, S, D) float32. params: dict of f32 weights in x@W layout."""
    B, S, D = src.shape
    FF = params["w1"].shape[1]
    eps = 1e-5

    tq = min(tq, S)
    assert S % tq == 0, "S must be divisible by the query tile"
    n_q_tiles = S // tq

    ff_chunk = min(ff_chunk, FF)
    assert FF % ff_chunk == 0, "FF must be divisible by the FF chunk"
    n_ff_chunks = FF // ff_chunk

    bf = jnp.bfloat16
    # bf16 weight matrices feed the MXU at full rate and halve resident VMEM;
    # biases / LayerNorm params stay f32 (they only touch the VPU).
    weight_args = (
        params["wq"].astype(bf), params["bq"],
        params["wk"].astype(bf), params["bk"],
        params["wv"].astype(bf), params["bv"],
        params["wo"].astype(bf), params["bo"],
        params["w1"].astype(bf), params["b1"],
        params["w2"].astype(bf), params["b2"],
        params["g1"], params["be1"], params["g2"], params["be2"],
    )

    kernel = functools.partial(
        _encoder_kernel, d_model=D, nhead=nhead, eps=eps,
        tq=tq, ff_chunk=ff_chunk, n_ff_chunks=n_ff_chunks)

    def wspec(shape):
        n = len(shape)
        # Constant index_map: weights stay resident across the whole grid
        # (no re-DMA between grid steps).
        return pl.BlockSpec(shape, lambda b, qt: (0,) * n)

    in_specs = [pl.BlockSpec((pl.Squeezed(), S, D), lambda b, qt: (b, 0, 0))]
    in_specs += [wspec(w.shape) for w in weight_args]

    out_spec = pl.BlockSpec((pl.Squeezed(), tq, D), lambda b, qt: (b, qt, 0))

    return pl.pallas_call(
        kernel,
        out_shape=jax.ShapeDtypeStruct((B, S, D), src.dtype),
        grid_spec=pltpu.PrefetchScalarGridSpec(
            num_scalar_prefetch=0,
            grid=(B, n_q_tiles),
            in_specs=in_specs,
            out_specs=out_spec,
            scratch_shapes=[
                pltpu.VMEM((S, D), bf),   # K cache (persists across q tiles)
                pltpu.VMEM((S, D), bf),   # V cache
            ],
        ),
        compiler_params=pltpu.CompilerParams(
            # batch axis parallel (megacore), q-tile axis sequential so the
            # K/V scratch computed at qt==0 is reused by later tiles.
            dimension_semantics=("parallel", "arbitrary"),
            vmem_limit_bytes=vmem_limit_bytes),
    )(src, *weight_args)


def _init_params(key, d_model, nhead, dim_feedforward):
    """Deterministic init mirroring PyTorch shapes. Linear weights stored
    pre-transposed as (in, out) so the kernel does x @ W + b."""
    ks = jax.random.split(key, 12)

    def lin(k, fan_in, fan_out):
        bound = 1.0 / math.sqrt(fan_in)
        kw, kb = jax.random.split(k)
        w = jax.random.uniform(kw, (fan_in, fan_out), jnp.float32, -bound, bound)
        b = jax.random.uniform(kb, (1, fan_out), jnp.float32, -bound, bound)
        return w, b

    wq, bq = lin(ks[0], d_model, d_model)
    wk, bk = lin(ks[1], d_model, d_model)
    wv, bv = lin(ks[2], d_model, d_model)
    wo, bo = lin(ks[3], d_model, d_model)
    w1, b1 = lin(ks[4], d_model, dim_feedforward)
    w2, b2 = lin(ks[5], dim_feedforward, d_model)

    return dict(
        wq=wq, bq=bq, wk=wk, bk=bk, wv=wv, bv=bv, wo=wo, bo=bo,
        w1=w1, b1=b1, w2=w2, b2=b2,
        g1=jnp.ones((1, d_model), jnp.float32),
        be1=jnp.zeros((1, d_model), jnp.float32),
        g2=jnp.ones((1, d_model), jnp.float32),
        be2=jnp.zeros((1, d_model), jnp.float32),
    )


def _reference(src, p, nhead):
    """Pure-JAX reference with the same bf16-at-MXU-boundary numerics."""
    D = src.shape[-1]
    eps = 1e-5
    bf = jnp.bfloat16

    def mm(a, b):
        return jnp.dot(a.astype(bf), b.astype(bf), preferred_element_type=jnp.float32)

    x = src.astype(jnp.float32)
    q = mm(x, p["wq"]) + p["bq"]
    k = mm(x, p["wk"]) + p["bk"]
    v = mm(x, p["wv"]) + p["bv"]
    scale = 1.0 / math.sqrt(D / nhead)
    s = jnp.einsum("bqd,bkd->bqk", (q * scale).astype(bf), k.astype(bf),
                   preferred_element_type=jnp.float32)
    pr = jax.nn.softmax(s, axis=-1)
    attn = jnp.einsum("bqk,bkd->bqd", pr.astype(bf), v.astype(bf),
                      preferred_element_type=jnp.float32)
    attn = mm(attn, p["wo"]) + p["bo"]

    def ln(y, g, b):
        mu = jnp.mean(y, -1, keepdims=True)
        var = jnp.mean((y - mu) ** 2, -1, keepdims=True)
        return (y - mu) * jax.lax.rsqrt(var + eps) * g + b

    x = ln(x + attn, p["g1"], p["be1"])
    h = jnp.maximum(mm(x, p["w1"]) + p["b1"], 0.0)
    ff = mm(h, p["w2"]) + p["b2"]
    x = ln(x + ff, p["g2"], p["be2"])
    return x


if __name__ == "__main__":
    # Small but lane-dense config: D is a multiple of 128 so every block's last
    # dim fills the 128-lane vregs and stores are unmasked.
    B, S, D, NHEAD, FF = 2, 8, 128, 4, 256

    key = jax.random.PRNGKey(0)
    k_src, k_par = jax.random.split(key)
    src = jax.random.normal(k_src, (B, S, D), jnp.float32)
    params = _init_params(k_par, D, NHEAD, FF)

    out = transformer_encoder_layer(src, params, nhead=NHEAD)
    out = jax.block_until_ready(out)

    ref = _reference(src, params, NHEAD)
    assert out.shape == (B, S, D)
    # Tolerance covers approx-reciprocal softmax and accumulation-order deltas;
    # the reference already mirrors the bf16 matmul-input casting.
    assert jnp.allclose(out, ref, atol=1e-2, rtol=1e-2), "mismatch vs reference"

    print("KERNEL_OK")
</pallas_src>

<mosaic_0001>
module attributes {stable_mosaic.version = 11 : i64} {
  func.func @_encoder_kernel(%arg0: i32, %arg1: i32, %arg2: memref<1x8x128xf32, #tpu.memory_space<vmem>>, %arg3: memref<128x128xbf16, #tpu.memory_space<vmem>>, %arg4: memref<1x128xf32, #tpu.memory_space<vmem>>, %arg5: memref<128x128xbf16, #tpu.memory_space<vmem>>, %arg6: memref<1x128xf32, #tpu.memory_space<vmem>>, %arg7: memref<128x128xbf16, #tpu.memory_space<vmem>>, %arg8: memref<1x128xf32, #tpu.memory_space<vmem>>, %arg9: memref<128x128xbf16, #tpu.memory_space<vmem>>, %arg10: memref<1x128xf32, #tpu.memory_space<vmem>>, %arg11: memref<128x256xbf16, #tpu.memory_space<vmem>>, %arg12: memref<1x256xf32, #tpu.memory_space<vmem>>, %arg13: memref<256x128xbf16, #tpu.memory_space<vmem>>, %arg14: memref<1x128xf32, #tpu.memory_space<vmem>>, %arg15: memref<1x128xf32, #tpu.memory_space<vmem>>, %arg16: memref<1x128xf32, #tpu.memory_space<vmem>>, %arg17: memref<1x128xf32, #tpu.memory_space<vmem>>, %arg18: memref<1x128xf32, #tpu.memory_space<vmem>>, %arg19: memref<1x8x128xf32, #tpu.memory_space<vmem>>, %arg20: memref<8x128xbf16, #tpu.memory_space<vmem>>, %arg21: memref<8x128xbf16, #tpu.memory_space<vmem>>) attributes {dimension_semantics = [#tpu.dimension_semantics<parallel>, #tpu.dimension_semantics<arbitrary>], iteration_bounds = array<i64: 2, 1>, scalar_prefetch = 0 : i64, scratch_operands = 2 : i64, tpu.core_type = #tpu.core_type<tc>, window_params = [{transform_indices = @transform_0, window_bounds = array<i64: 1, 8, 128>}, {pipeline_mode = #tpu.pipeline_mode<synchronous>, transform_indices = @transform_1, window_bounds = array<i64: 128, 128>}, {pipeline_mode = #tpu.pipeline_mode<synchronous>, transform_indices = @transform_2, window_bounds = array<i64: 1, 128>}, {pipeline_mode = #tpu.pipeline_mode<synchronous>, transform_indices = @transform_3, window_bounds = array<i64: 128, 128>}, {pipeline_mode = #tpu.pipeline_mode<synchronous>, transform_indices = @transform_4, window_bounds = array<i64: 1, 128>}, {pipeline_mode = #tpu.pipeline_mode<synchronous>, transform_indices = @transform_5, window_bounds = array<i64: 128, 128>}, {pipeline_mode = #tpu.pipeline_mode<synchronous>, transform_indices = @transform_6, window_bounds = array<i64: 1, 128>}, {pipeline_mode = #tpu.pipeline_mode<synchronous>, transform_indices = @transform_7, window_bounds = array<i64: 128, 128>}, {pipeline_mode = #tpu.pipeline_mode<synchronous>, transform_indices = @transform_8, window_bounds = array<i64: 1, 128>}, {pipeline_mode = #tpu.pipeline_mode<synchronous>, transform_indices = @transform_9, window_bounds = array<i64: 128, 256>}, {pipeline_mode = #tpu.pipeline_mode<synchronous>, transform_indices = @transform_10, window_bounds = array<i64: 1, 256>}, {pipeline_mode = #tpu.pipeline_mode<synchronous>, transform_indices = @transform_11, window_bounds = array<i64: 256, 128>}, {pipeline_mode = #tpu.pipeline_mode<synchronous>, transform_indices = @transform_12, window_bounds = array<i64: 1, 128>}, {pipeline_mode = #tpu.pipeline_mode<synchronous>, transform_indices = @transform_13, window_bounds = array<i64: 1, 128>}, {pipeline_mode = #tpu.pipeline_mode<synchronous>, transform_indices = @transform_14, window_bounds = array<i64: 1, 128>}, {pipeline_mode = #tpu.pipeline_mode<synchronous>, transform_indices = @transform_15, window_bounds = array<i64: 1, 128>}, {pipeline_mode = #tpu.pipeline_mode<synchronous>, transform_indices = @transform_16, window_bounds = array<i64: 1, 128>}, {transform_indices = @transform_17, window_bounds = array<i64: 1, 8, 128>}]} {
    %c0_i32 = arith.constant 0 : i32
    %0 = arith.cmpi eq, %arg1, %c0_i32 : i32
    %1 = arith.extui %0 : i1 to i32
    %c0_i32_0 = arith.constant 0 : i32
    %2 = arith.cmpi ne, %1, %c0_i32_0 : i32
    scf.if %2 {
      %c0_52 = arith.constant 0 : index
      %c0_53 = arith.constant 0 : index
      %c0_54 = arith.constant 0 : index
      %105 = vector.load %arg2[%c0_52, %c0_53, %c0_54] : memref<1x8x128xf32, #tpu.memory_space<vmem>>, vector<1x8x128xf32>
      %106 = vector.shape_cast %105 : vector<1x8x128xf32> to vector<8x128xf32>
      %107 = arith.truncf %106 : vector<8x128xf32> to vector<8x128xbf16>
      %c0_55 = arith.constant 0 : index
      %c0_56 = arith.constant 0 : index
      %108 = vector.load %arg5[%c0_55, %c0_56] : memref<128x128xbf16, #tpu.memory_space<vmem>>, vector<128x128xbf16>
      %cst_57 = arith.constant dense<0.000000e+00> : vector<8x128xf32>
      %109 = tpu.matmul %107, %108, %cst_57 {dimension_numbers = #tpu.dot_dimension_numbers<[1], [0], [0], [1], [0, 0, 1, 1], [], []>} : vector<8x128xbf16>, vector<128x128xbf16>, vector<8x128xf32> -> vector<8x128xf32>
      %c0_58 = arith.constant 0 : index
      %c0_59 = arith.constant 0 : index
      %110 = vector.load %arg6[%c0_58, %c0_59] : memref<1x128xf32, #tpu.memory_space<vmem>>, vector<1x128xf32>
      %111 = vector.broadcast %110 : vector<1x128xf32> to vector<8x128xf32>
      %112 = arith.addf %109, %111 : vector<8x128xf32>
      %c0_60 = arith.constant 0 : index
      %c0_61 = arith.constant 0 : index
      %113 = vector.load %arg7[%c0_60, %c0_61] : memref<128x128xbf16, #tpu.memory_space<vmem>>, vector<128x128xbf16>
      %cst_62 = arith.constant dense<0.000000e+00> : vector<8x128xf32>
      %114 = tpu.matmul %107, %113, %cst_62 {dimension_numbers = #tpu.dot_dimension_numbers<[1], [0], [0], [1], [0, 0, 1, 1], [], []>} : vector<8x128xbf16>, vector<128x128xbf16>, vector<8x128xf32> -> vector<8x128xf32>
      %c0_63 = arith.constant 0 : index
      %c0_64 = arith.constant 0 : index
      %115 = vector.load %arg8[%c0_63, %c0_64] : memref<1x128xf32, #tpu.memory_space<vmem>>, vector<1x128xf32>
      %116 = vector.broadcast %115 : vector<1x128xf32> to vector<8x128xf32>
      %117 = arith.addf %114, %116 : vector<8x128xf32>
      %118 = arith.truncf %112 : vector<8x128xf32> to vector<8x128xbf16>
      %c0_65 = arith.constant 0 : index
      %c0_66 = arith.constant 0 : index
      %119 = vector.load %arg20[%c0_65, %c0_66] : memref<8x128xbf16, #tpu.memory_space<vmem>>, vector<8x128xbf16>
      tpu.vector_store %arg20[%c0_65, %c0_66], %118 {strides = array<i32>} : memref<8x128xbf16, #tpu.memory_space<vmem>>, vector<8x128xbf16>,
      %120 = arith.truncf %117 : vector<8x128xf32> to vector<8x128xbf16>
      %c0_67 = arith.constant 0 : index
      %c0_68 = arith.constant 0 : index
      %121 = vector.load %arg21[%c0_67, %c0_68] : memref<8x128xbf16, #tpu.memory_space<vmem>>, vector<8x128xbf16>
      tpu.vector_store %arg21[%c0_67, %c0_68], %120 {strides = array<i32>} : memref<8x128xbf16, #tpu.memory_space<vmem>>, vector<8x128xbf16>,
    } else {
    }
    %c8_i32 = arith.constant 8 : i32
    %3 = arith.muli %arg1, %c8_i32 : i32
    %4 = tpu.assume_multiple %3, 8 : i32
    %c0 = arith.constant 0 : index
    %5 = arith.index_cast %4 : i32 to index
    %c0_1 = arith.constant 0 : index
    %6 = vector.load %arg2[%c0, %5, %c0_1] : memref<1x8x128xf32, #tpu.memory_space<vmem>>, vector<1x8x128xf32>
    %7 = vector.shape_cast %6 : vector<1x8x128xf32> to vector<8x128xf32>
    %8 = arith.truncf %7 : vector<8x128xf32> to vector<8x128xbf16>
    %c0_2 = arith.constant 0 : index
    %c0_3 = arith.constant 0 : index
    %9 = vector.load %arg3[%c0_2, %c0_3] : memref<128x128xbf16, #tpu.memory_space<vmem>>, vector<128x128xbf16>
    %cst = arith.constant dense<0.000000e+00> : vector<8x128xf32>
    %10 = tpu.matmul %8, %9, %cst {dimension_numbers = #tpu.dot_dimension_numbers<[1], [0], [0], [1], [0, 0, 1, 1], [], []>} : vector<8x128xbf16>, vector<128x128xbf16>, vector<8x128xf32> -> vector<8x128xf32>
    %c0_4 = arith.constant 0 : index
    %c0_5 = arith.constant 0 : index
    %11 = vector.load %arg4[%c0_4, %c0_5] : memref<1x128xf32, #tpu.memory_space<vmem>>, vector<1x128xf32>
    %12 = vector.broadcast %11 : vector<1x128xf32> to vector<8x128xf32>
    %13 = arith.addf %10, %12 : vector<8x128xf32>
    %cst_6 = arith.constant 0.176776692 : f32
    %14 = vector.broadcast %cst_6 : f32 to vector<8x128xf32>
    %15 = arith.mulf %13, %14 : vector<8x128xf32>
    %16 = arith.truncf %15 : vector<8x128xf32> to vector<8x128xbf16>
    %c0_7 = arith.constant 0 : index
    %c0_8 = arith.constant 0 : index
    %17 = vector.load %arg20[%c0_7, %c0_8] : memref<8x128xbf16, #tpu.memory_space<vmem>>, vector<8x128xbf16>
    %cst_9 = arith.constant dense<0.000000e+00> : vector<8x8xf32>
    %18 = tpu.matmul %16, %17, %cst_9 {dimension_numbers = #tpu.dot_dimension_numbers<[1], [1], [0], [0], [0, 0, 1, 0], [], []>} : vector<8x128xbf16>, vector<8x128xbf16>, vector<8x8xf32> -> vector<8x8xf32>
    %cst_10 = arith.constant dense<0xFF800000> : vector<8xf32>
    %19 = vector.multi_reduction <maximumf>, %18, %cst_10 [1] : vector<8x8xf32> to vector<8xf32>
    %20 = vector.shape_cast %19 : vector<8xf32> to vector<8x1xf32>
    %21 = vector.broadcast %20 : vector<8x1xf32> to vector<8x8xf32>
    %22 = arith.subf %18, %21 : vector<8x8xf32>
    %23 = math.exp %22 : vector<8x8xf32>
    %cst_11 = arith.constant dense<0.000000e+00> : vector<8xf32>
    %24 = vector.multi_reduction <add>, %23, %cst_11 [1] : vector<8x8xf32> to vector<8xf32>
    %25 = vector.shape_cast %24 : vector<8xf32> to vector<8x1xf32>
    %26 = tpu.reciprocal %25 {approx = true} : vector<8x1xf32> -> vector<8x1xf32>
    %27 = vector.broadcast %26 : vector<8x1xf32> to vector<8x8xf32>
    %28 = arith.mulf %23, %27 : vector<8x8xf32>
    %29 = arith.truncf %28 : vector<8x8xf32> to vector<8x8xbf16>
    %c0_12 = arith.constant 0 : index
    %c0_13 = arith.constant 0 : index
    %30 = vector.load %arg21[%c0_12, %c0_13] : memref<8x128xbf16, #tpu.memory_space<vmem>>, vector<8x128xbf16>
    %cst_14 = arith.constant dense<0.000000e+00> : vector<8x128xf32>
    %31 = tpu.matmul %29, %30, %cst_14 {dimension_numbers = #tpu.dot_dimension_numbers<[1], [0], [0], [1], [0, 0, 1, 1], [], []>} : vector<8x8xbf16>, vector<8x128xbf16>, vector<8x128xf32> -> vector<8x128xf32>
    %32 = arith.truncf %31 : vector<8x128xf32> to vector<8x128xbf16>
    %c0_15 = arith.constant 0 : index
    %c0_16 = arith.constant 0 : index
    %33 = vector.load %arg9[%c0_15, %c0_16] : memref<128x128xbf16, #tpu.memory_space<vmem>>, vector<128x128xbf16>
    %cst_17 = arith.constant dense<0.000000e+00> : vector<8x128xf32>
    %34 = tpu.matmul %32, %33, %cst_17 {dimension_numbers = #tpu.dot_dimension_numbers<[1], [0], [0], [1], [0, 0, 1, 1], [], []>} : vector<8x128xbf16>, vector<128x128xbf16>, vector<8x128xf32> -> vector<8x128xf32>
    %c0_18 = arith.constant 0 : index
    %c0_19 = arith.constant 0 : index
    %35 = vector.load %arg10[%c0_18, %c0_19] : memref<1x128xf32, #tpu.memory_space<vmem>>, vector<1x128xf32>
    %36 = vector.broadcast %35 : vector<1x128xf32> to vector<8x128xf32>
    %37 = arith.addf %34, %36 : vector<8x128xf32>
    %38 = arith.addf %7, %37 : vector<8x128xf32>
    %cst_20 = arith.constant dense<0.000000e+00> : vector<8xf32>
    %39 = vector.multi_reduction <add>, %38, %cst_20 [1] : vector<8x128xf32> to vector<8xf32>
    %40 = vector.shape_cast %39 : vector<8xf32> to vector<8x1xf32>
    %cst_21 = arith.constant 1.280000e+02 : f32
    %41 = vector.broadcast %cst_21 : f32 to vector<8x1xf32>
    %42 = arith.divf %40, %41 : vector<8x1xf32>
    %43 = vector.broadcast %42 : vector<8x1xf32> to vector<8x128xf32>
    %44 = arith.subf %38, %43 : vector<8x128xf32>
    %45 = arith.mulf %44, %44 : vector<8x128xf32>
    %cst_22 = arith.constant dense<0.000000e+00> : vector<8xf32>
    %46 = vector.multi_reduction <add>, %45, %cst_22 [1] : vector<8x128xf32> to vector<8xf32>
    %47 = vector.shape_cast %46 : vector<8xf32> to vector<8x1xf32>
    %cst_23 = arith.constant 1.280000e+02 : f32
    %48 = vector.broadcast %cst_23 : f32 to vector<8x1xf32>
    %49 = arith.divf %47, %48 : vector<8x1xf32>
    %50 = vector.broadcast %42 : vector<8x1xf32> to vector<8x128xf32>
    %51 = arith.subf %38, %50 : vector<8x128xf32>
    %cst_24 = arith.constant 9.99999974E-6 : f32
    %52 = vector.broadcast %cst_24 : f32 to vector<8x1xf32>
    %53 = arith.addf %49, %52 : vector<8x1xf32>
    %54 = math.rsqrt %53 : vector<8x1xf32>
    %55 = vector.broadcast %54 : vector<8x1xf32> to vector<8x128xf32>
    %56 = arith.mulf %51, %55 : vector<8x128xf32>
    %c0_25 = arith.constant 0 : index
    %c0_26 = arith.constant 0 : index
    %57 = vector.load %arg15[%c0_25, %c0_26] : memref<1x128xf32, #tpu.memory_space<vmem>>, vector<1x128xf32>
    %58 = vector.broadcast %57 : vector<1x128xf32> to vector<8x128xf32>
    %59 = arith.mulf %56, %58 : vector<8x128xf32>
    %c0_27 = arith.constant 0 : index
    %c0_28 = arith.constant 0 : index
    %60 = vector.load %arg16[%c0_27, %c0_28] : memref<1x128xf32, #tpu.memory_space<vmem>>, vector<1x128xf32>
    %61 = vector.broadcast %60 : vector<1x128xf32> to vector<8x128xf32>
    %62 = arith.addf %59, %61 : vector<8x128xf32>
    %63 = arith.truncf %62 : vector<8x128xf32> to vector<8x128xbf16>
    %c0_29 = arith.constant 0 : index
    %c0_30 = arith.constant 0 : index
    %64 = vector.load %arg11[%c0_29, %c0_30] : memref<128x256xbf16, #tpu.memory_space<vmem>>, vector<128x256xbf16>
    %cst_31 = arith.constant dense<0.000000e+00> : vector<8x256xf32>
    %65 = tpu.matmul %63, %64, %cst_31 {dimension_numbers = #tpu.dot_dimension_numbers<[1], [0], [0], [1], [0, 0, 1, 1], [], []>} : vector<8x128xbf16>, vector<128x256xbf16>, vector<8x256xf32> -> vector<8x256xf32>
    %c0_32 = arith.constant 0 : index
    %c0_33 = arith.constant 0 : index
    %66 = vector.load %arg12[%c0_32, %c0_33] : memref<1x256xf32, #tpu.memory_space<vmem>>, vector<1x256xf32>
    %67 = vector.broadcast %66 : vector<1x256xf32> to vector<8x256xf32>
    %68 = arith.addf %65, %67 : vector<8x256xf32>
    %cst_34 = arith.constant 0.000000e+00 : f32
    %69 = vector.broadcast %cst_34 : f32 to vector<8x256xf32>
    %70 = arith.maximumf %68, %69 : vector<8x256xf32>
    %71 = arith.truncf %70 : vector<8x256xf32> to vector<8x256xbf16>
    %c0_35 = arith.constant 0 : index
    %c0_36 = arith.constant 0 : index
    %72 = vector.load %arg13[%c0_35, %c0_36] : memref<256x128xbf16, #tpu.memory_space<vmem>>, vector<256x128xbf16>
    %cst_37 = arith.constant dense<0.000000e+00> : vector<8x128xf32>
    %73 = tpu.matmul %71, %72, %cst_37 {dimension_numbers = #tpu.dot_dimension_numbers<[1], [0], [0], [1], [0, 0, 1, 1], [], []>} : vector<8x256xbf16>, vector<256x128xbf16>, vector<8x128xf32> -> vector<8x128xf32>
    %c0_38 = arith.constant 0 : index
    %c0_39 = arith.constant 0 : index
    %74 = vector.load %arg14[%c0_38, %c0_39] : memref<1x128xf32, #tpu.memory_space<vmem>>, vector<1x128xf32>
    %75 = vector.broadcast %74 : vector<1x128xf32> to vector<8x128xf32>
    %76 = arith.addf %73, %75 : vector<8x128xf32>
    %77 = arith.addf %62, %76 : vector<8x128xf32>
    %cst_40 = arith.constant dense<0.000000e+00> : vector<8xf32>
    %78 = vector.multi_reduction <add>, %77, %cst_40 [1] : vector<8x128xf32> to vector<8xf32>
    %79 = vector.shape_cast %78 : vector<8xf32> to vector<8x1xf32>
    %cst_41 = arith.constant 1.280000e+02 : f32
    %80 = vector.broadcast %cst_41 : f32 to vector<8x1xf32>
    %81 = arith.divf %79, %80 : vector<8x1xf32>
    %82 = vector.broadcast %81 : vector<8x1xf32> to vector<8x128xf32>
    %83 = arith.subf %77, %82 : vector<8x128xf32>
    %84 = arith.mulf %83, %83 : vector<8x128xf32>
    %cst_42 = arith.constant dense<0.000000e+00> : vector<8xf32>
    %85 = vector.multi_reduction <add>, %84, %cst_42 [1] : vector<8x128xf32> to vector<8xf32>
    %86 = vector.shape_cast %85 : vector<8xf32> to vector<8x1xf32>
    %cst_43 = arith.constant 1.280000e+02 : f32
    %87 = vector.broadcast %cst_43 : f32 to vector<8x1xf32>
    %88 = arith.divf %86, %87 : vector<8x1xf32>
    %89 = vector.broadcast %81 : vector<8x1xf32> to vector<8x128xf32>
    %90 = arith.subf %77, %89 : vector<8x128xf32>
    %cst_44 = arith.constant 9.99999974E-6 : f32
    %91 = vector.broadcast %cst_44 : f32 to vector<8x1xf32>
    %92 = arith.addf %88, %91 : vector<8x1xf32>
    %93 = math.rsqrt %92 : vector<8x1xf32>
    %94 = vector.broadcast %93 : vector<8x1xf32> to vector<8x128xf32>
    %95 = arith.mulf %90, %94 : vector<8x128xf32>
    %c0_45 = arith.constant 0 : index
    %c0_46 = arith.constant 0 : index
    %96 = vector.load %arg17[%c0_45, %c0_46] : memref<1x128xf32, #tpu.memory_space<vmem>>, vector<1x128xf32>
    %97 = vector.broadcast %96 : vector<1x128xf32> to vector<8x128xf32>
    %98 = arith.mulf %95, %97 : vector<8x128xf32>
    %c0_47 = arith.constant 0 : index
    %c0_48 = arith.constant 0 : index
    %99 = vector.load %arg18[%c0_47, %c0_48] : memref<1x128xf32, #tpu.memory_space<vmem>>, vector<1x128xf32>
    %100 = vector.broadcast %99 : vector<1x128xf32> to vector<8x128xf32>
    %101 = arith.addf %98, %100 : vector<8x128xf32>
    %c0_49 = arith.constant 0 : index
    %c0_50 = arith.constant 0 : index
    %c0_51 = arith.constant 0 : index
    %102 = vector.load %arg19[%c0_49, %c0_50, %c0_51] : memref<1x8x128xf32, #tpu.memory_space<vmem>>, vector<1x8x128xf32>
    %103 = vector.shape_cast %102 : vector<1x8x128xf32> to vector<8x128xf32>
    %104 = vector.shape_cast %101 : vector<8x128xf32> to vector<1x8x128xf32>
    tpu.vector_store %arg19[%c0_49, %c0_50, %c0_51], %104 {strides = array<i32>} : memref<1x8x128xf32, #tpu.memory_space<vmem>>, vector<1x8x128xf32>,
    return
  }
  func.func @transform_0(%arg0: i32, %arg1: i32) -> (i32, i32, i32) {
    %c0_i32 = arith.constant 0 : i32
    %c0_i32_0 = arith.constant 0 : i32
    %c0_i32_1 = arith.constant 0 : i32
    return %arg0, %c0_i32, %c0_i32_0 : i32, i32, i32
  }
  func.func @transform_1(%arg0: i32, %arg1: i32) -> (i32, i32) {
    %c0_i32 = arith.constant 0 : i32
    %c0_i32_0 = arith.constant 0 : i32
    %c0_i32_1 = arith.constant 0 : i32
    return %c0_i32, %c0_i32_0 : i32, i32
  }
  func.func @transform_2(%arg0: i32, %arg1: i32) -> (i32, i32) {
    %c0_i32 = arith.constant 0 : i32
    %c0_i32_0 = arith.constant 0 : i32
    %c0_i32_1 = arith.constant 0 : i32
    return %c0_i32, %c0_i32_0 : i32, i32
  }
  func.func @transform_3(%arg0: i32, %arg1: i32) -> (i32, i32) {
    %c0_i32 = arith.constant 0 : i32
    %c0_i32_0 = arith.constant 0 : i32
    %c0_i32_1 = arith.constant 0 : i32
    return %c0_i32, %c0_i32_0 : i32, i32
  }
  func.func @transform_4(%arg0: i32, %arg1: i32) -> (i32, i32) {
    %c0_i32 = arith.constant 0 : i32
    %c0_i32_0 = arith.constant 0 : i32
    %c0_i32_1 = arith.constant 0 : i32
    return %c0_i32, %c0_i32_0 : i32, i32
  }
  func.func @transform_5(%arg0: i32, %arg1: i32) -> (i32, i32) {
    %c0_i32 = arith.constant 0 : i32
    %c0_i32_0 = arith.constant 0 : i32
    %c0_i32_1 = arith.constant 0 : i32
    return %c0_i32, %c0_i32_0 : i32, i32
  }
  func.func @transform_6(%arg0: i32, %arg1: i32) -> (i32, i32) {
    %c0_i32 = arith.constant 0 : i32
    %c0_i32_0 = arith.constant 0 : i32
    %c0_i32_1 = arith.constant 0 : i32
    return %c0_i32, %c0_i32_0 : i32, i32
  }
  func.func @transform_7(%arg0: i32, %arg1: i32) -> (i32, i32) {
    %c0_i32 = arith.constant 0 : i32
    %c0_i32_0 = arith.constant 0 : i32
    %c0_i32_1 = arith.constant 0 : i32
    return %c0_i32, %c0_i32_0 : i32, i32
  }
  func.func @transform_8(%arg0: i32, %arg1: i32) -> (i32, i32) {
    %c0_i32 = arith.constant 0 : i32
    %c0_i32_0 = arith.constant 0 : i32
    %c0_i32_1 = arith.constant 0 : i32
    return %c0_i32, %c0_i32_0 : i32, i32
  }
  func.func @transform_9(%arg0: i32, %arg1: i32) -> (i32, i32) {
    %c0_i32 = arith.constant 0 : i32
    %c0_i32_0 = arith.constant 0 : i32
    %c0_i32_1 = arith.constant 0 : i32
    return %c0_i32, %c0_i32_0 : i32, i32
  }
  func.func @transform_10(%arg0: i32, %arg1: i32) -> (i32, i32) {
    %c0_i32 = arith.constant 0 : i32
    %c0_i32_0 = arith.constant 0 : i32
    %c0_i32_1 = arith.constant 0 : i32
    return %c0_i32, %c0_i32_0 : i32, i32
  }
  func.func @transform_11(%arg0: i32, %arg1: i32) -> (i32, i32) {
    %c0_i32 = arith.constant 0 : i32
    %c0_i32_0 = arith.constant 0 : i32
    %c0_i32_1 = arith.constant 0 : i32
    return %c0_i32, %c0_i32_0 : i32, i32
  }
  func.func @transform_12(%arg0: i32, %arg1: i32) -> (i32, i32) {
    %c0_i32 = arith.constant 0 : i32
    %c0_i32_0 = arith.constant 0 : i32
    %c0_i32_1 = arith.constant 0 : i32
    return %c0_i32, %c0_i32_0 : i32, i32
  }
  func.func @transform_13(%arg0: i32, %arg1: i32) -> (i32, i32) {
    %c0_i32 = arith.constant 0 : i32
    %c0_i32_0 = arith.constant 0 : i32
    %c0_i32_1 = arith.constant 0 : i32
    return %c0_i32, %c0_i32_0 : i32, i32
  }
  func.func @transform_14(%arg0: i32, %arg1: i32) -> (i32, i32) {
    %c0_i32 = arith.constant 0 : i32
    %c0_i32_0 = arith.constant 0 : i32
    %c0_i32_1 = arith.constant 0 : i32
    return %c0_i32, %c0_i32_0 : i32, i32
  }
  func.func @transform_15(%arg0: i32, %arg1: i32) -> (i32, i32) {
    %c0_i32 = arith.constant 0 : i32
    %c0_i32_0 = arith.constant 0 : i32
    %c0_i32_1 = arith.constant 0 : i32
    return %c0_i32, %c0_i32_0 : i32, i32
  }
  func.func @transform_16(%arg0: i32, %arg1: i32) -> (i32, i32) {
    %c0_i32 = arith.constant 0 : i32
    %c0_i32_0 = arith.constant 0 : i32
    %c0_i32_1 = arith.constant 0 : i32
    return %c0_i32, %c0_i32_0 : i32, i32
  }
  func.func @transform_17(%arg0: i32, %arg1: i32) -> (i32, i32, i32) {
    %c0_i32 = arith.constant 0 : i32
    %c0_i32_0 = arith.constant 0 : i32
    return %arg0, %arg1, %c0_i32 : i32, i32, i32
  }
}

</mosaic_0001>

<bundles_post_ra>
// kernel: tpu_custom_call.1
= control target key start
LH: loop header
LB: loop body
LE: loop exit
PB: predicated region body
PF: predicated region fallthrough
CT: control target
= control target key end

     0   :  { %s3897_s0 = inlined_call_operand.hbm [shape: f32[2,8,128], index: 0, kind: input, shape index: {}]   ;;  %s3898_s1 = inlined_call_operand.hbm [shape: bf16[128,128], index: 1, kind: input, shape index: {}]   ;;  %s3899_s2 = inlined_call_operand.hbm [shape: f32[1,128], index: 2, kind: input, shape index: {}]   ;;  %s3900_s3 = inlined_call_operand.hbm [shape: bf16[128,128], index: 3, kind: input, shape index: {}]   ;;  %s3901_s4 = inlined_call_operand.hbm [shape: f32[1,128], index: 4, kind: input, shape index: {}]   ;;  %s3902_s5 = inlined_call_operand.hbm [shape: bf16[128,128], index: 5, kind: input, shape index: {}]   ;;  %s3903_s6 = inlined_call_operand.hbm [shape: f32[1,128], index: 6, kind: input, shape index: {}]   ;;  %s3904_s7 = inlined_call_operand.hbm [shape: bf16[128,128], index: 7, kind: input, shape index: {}]   ;;  %s3905_s8 = inlined_call_operand.hbm [shape: f32[1,128], index: 8, kind: input, shape index: {}]   ;;  %s3906_s9 = inlined_call_operand.hbm [shape: bf16[128,256], index: 9, kind: input, shape index: {}]   ;;  %s3907_s10 = inlined_call_operand.hbm [shape: f32[1,256], index: 10, kind: input, shape index: {}]   ;;  %s3908_s11 = inlined_call_operand.hbm [shape: bf16[256,128], index: 11, kind: input, shape index: {}]   ;;  %s3909_s12 = inlined_call_operand.hbm [shape: f32[1,128], index: 12, kind: input, shape index: {}]   ;;  %s3910_s13 = inlined_call_operand.hbm [shape: f32[1,128], index: 13, kind: input, shape index: {}]   ;;  %s3911_s14 = inlined_call_operand.hbm [shape: f32[1,128], index: 14, kind: input, shape index: {}]   ;;  %s3912_s15 = inlined_call_operand.hbm [shape: f32[1,128], index: 15, kind: input, shape index: {}]   ;;  %s3913_s16 = inlined_call_operand.hbm [shape: f32[1,128], index: 16, kind: input, shape index: {}]   ;;  %s3914_s17 = inlined_call_operand.hbm [shape: f32[2,8,128], index: 17, kind: output, shape index: {}]  }
   0x1   :  { %3936 = sst [smem:[#allocation50_spill]] %s3897_s0 }
   0x2   :  { %3937 = sst [smem:[#allocation51_spill]] %s3898_s1 }
   0x3   :  { %3938 = sst [smem:[#allocation52_spill]] %s3899_s2 }
   0x4   :  { %3939 = sst [smem:[#allocation53_spill]] %s3900_s3 }
   0x5   :  { %3940 = sst [smem:[#allocation54_spill]] %s3901_s4 }
   0x6   :  { %3941 = sst [smem:[#allocation55_spill]] %s3902_s5 }
   0x7   :  { %3942 = sst [smem:[#allocation56_spill]] %s3913_s16 }
   0x8   :  { %3943 = sst [smem:[#allocation57_spill]] %s3914_s17 }
   0x9   :  { %22 = vsyncpa [#allocation5], 0 }
   0xa   :  { %24 = vsyncpa [#allocation5 + $0x1], 0 }
   0xb   :  { %25 = vsyncpa [#allocation8], 0 }
   0xc   :  { %26 = vsyncpa [#allocation11], 0 }
   0xd   :  { %27 = vsyncpa [#allocation14], 0 }
   0xe   :  { %28 = vsyncpa [#allocation17], 0 }
   0xf   :  { %29 = vsyncpa [#allocation20], 0 }
  0x10   :  { %30 = vsyncpa [#allocation23], 0 }
  0x11   :  { %31 = vsyncpa [#allocation26], 0 }
  0x12   :  { %32 = vsyncpa [#allocation29], 0 }
  0x13   :  { %33 = vsyncpa [#allocation6], 0 }
  0x14   :  { %35 = vsyncpa [#allocation6 + $0x1], 0  ;;  %s3281_s24 = smov 0   ;;  %s3283_s25 = smov 0  }
  0x15   :  { %s3285_s26 = smov 0   ;;  %s3287_s27 = smov 0  }
  0x16   :  { %s3289_s28 = smov 0   ;;  %s3291_s29 = smov 0  }
  0x17 LB: > { %3944 = sst [smem:[#allocation42_spill]] %s3144_s24  ;;  %s3917_s0 = sadd.s32 4294967295, %s3164_s29   ;;  %s3164_s29 = sphi %s3291_s29, %s3998_s29   ;;  %s3160_s28 = sphi %s3289_s28, %s3997_s28   ;;  %s3156_s27 = sphi %s3287_s27, %s3995_s27   ;;  %s3152_s26 = sphi %s3285_s26, %s3996_s26   ;;  %s3148_s25 = sphi %s3283_s25, %s3994_s25   ;;  %s3144_s24 = sphi %s3281_s24, %s3993_s24  }
  0x18   : > { %3945 = sst [smem:[#allocation43_spill]] %s3148_s25  ;;  %p1991_p0 = scmp.ge.s32.totalorder %s3164_s29, 1 }
  0x19   : > { %3946 = sst [smem:[#allocation44_spill]] %s3152_s26  ;;  %p3315_p1 = scmp.eq.s32.totalorder %s3917_s0, 0 }
  0x1a   : > { %3947 = sst [smem:[#allocation45_spill]] %s3156_s27  ;;  %p448_p2 = scmp.lt.s32.totalorder %s3164_s29, 3 }
  0x1b   : > { %3948 = sst [smem:[#allocation46_spill]] %s3160_s28  ;;  %s3166_s19 = smov [#allocation7]  }
  0x1c   : > { %3949 = sst [smem:[#allocation47_spill]] %s3164_s29  ;;  %p3320_p3 = pnand %p1991_p0, %p448_p2 }
  0x1d   : > { %s3950_s30 = scalar_select %p3315_p1, 1, 0 }
  0x1e   : > { %s3952_s18 = scalar_select %p3320_p3, 1, 0 }
  0x1f   : > { %3951 = sst [smem:[#allocation48_spill]] %s3950_s30  ;;  %s460_s1 = sshll.u32 %s3166_s19, 4  ;;  %s3324_s1 = int_to_ptr.vmem [resolvable:$true] %s460_s1 }
  0x20   : > { %3953 = sst [smem:[#allocation49_spill]] %s3952_s18  ;;  %p2330_p4 = pneg %p3320_p3 }
  0x21   : > { %s3167_s21 = smov [#allocation10]   ;;  %s3168_s23 = smov [#allocation13]  }
  0x22   : > { %p3331_p6 = pnand %p2330_p4, %p3315_p1  ;;  %s484_s22 = sshll.u32 %s3167_s21, 4  ;;  %s3335_s22 = int_to_ptr.vmem [resolvable:$true] %s484_s22 }
  0x23   : > { %s3337_s0 = sshll.u32 %s3168_s23, 4  ;;  %s3955_s27 = sld [smem:[#allocation51_spill]]  ;;  %s509_s0 = int_to_ptr.vmem [resolvable:$true] %s3337_s0 }
  0x24   : > { %p3347_p8 = pneg %p3331_p6 }
  0x29   : > { %s3956_s16 = smov %s3955_s27  ;;  %s2572_s24 = scalar_lea.hbm %s3955_s27, 1024 }
  0x2a   : > { %p2573_p7 = scmp.ne.s32.totalorder %s3956_s16, %s2572_s24  ;;  %p2579_p11 = scmp.lt.u32.totalorder %s2572_s24, %s3956_s16 }
  0x2c   : > { %p2575_p9 = pnand %p3347_p8, %p2573_p7 }
  0x2e   : > { %p2576_p10 = pneg %p2575_p9 }
  0x30   : > { %p2581_p12 = pnand %p2579_p11, %p2576_p10 }
  0x32   : > { %2584 = shalt.err (!%p2581_p12)
}
  0x33   : > { %s2585_s17 = scalar_lea.vmem %s3324_s1, 1024  ;;  %p2593_p4 = scmp.lt.s32.totalorder %s3324_s1, %s3324_s1 }
  0x34   : > { %p2586_p13 = scmp.ne.s32.totalorder %s3324_s1, %s2585_s17  ;;  %p2594_p5 = scmp.lt.s32.totalorder %s2585_s17, %s2585_s17 }
  0x36   : > { %p2588_p0 = pnand %p2586_p13, %p3347_p8  ;;  %p2595_p7 = por %p2594_p5, %p2593_p4 }
  0x38   : > { %p2589_p2 = pneg %p2588_p0 }
  0x3a   : > { %p2596_p9 = pnand %p2595_p7, %p2589_p2 }
  0x3c   : > { %2599 = shalt.err (!%p2596_p9)
}
  0x3d   : > { %s3932_s25 = smov 64   ;;  %s3933_s24 = smov 4  }
  0x3e   : > { %2333 = dma.hbm_to_vmem [thread:$0]  (!%p3331_p6), %s3956_s16, 1024, %s3324_s1, [#allocation8], %s3932_s25, %s3932_s25, %s3933_s24  }
  0x3f   : > { %s3958_s3 = sld [smem:[#allocation53_spill]] }
  0x45   : > { %s2600_s23 = scalar_lea.hbm %s3958_s3, 1024 }
  0x46   : > { %p2601_p5 = scmp.ne.s32.totalorder %s3958_s3, %s2600_s23  ;;  %p2607_p12 = scmp.lt.u32.totalorder %s2600_s23, %s3958_s3 }
  0x48   : > { %p2603_p10 = pnand %p2601_p5, %p3347_p8 }
  0x4a   : > { %p2604_p11 = pneg %p2603_p10 }
  0x4c   : > { %p2609_p13 = pnand %p2607_p12, %p2604_p11 }
  0x4e   : > { %2612 = shalt.err (!%p2609_p13)
}
  0x4f   : > { %s2613_s1 = scalar_lea.vmem %s3335_s22, 1024  ;;  %p2621_p7 = scmp.lt.s32.totalorder %s3335_s22, %s3335_s22 }
  0x50   : > { %p2614_p0 = scmp.ne.s32.totalorder %s3335_s22, %s2613_s1  ;;  %p2622_p9 = scmp.lt.s32.totalorder %s2613_s1, %s2613_s1 }
  0x52   : > { %p2616_p2 = pnand %p2614_p0, %p3347_p8  ;;  %p2623_p5 = por %p2622_p9, %p2621_p7 }
  0x54   : > { %p2617_p4 = pneg %p2616_p2 }
  0x56   : > { %p2624_p10 = pnand %p2623_p5, %p2617_p4 }
  0x58   : > { %2627 = shalt.err (!%p2624_p10)
}
  0x59   : > { %2339 = dma.hbm_to_vmem [thread:$0]  (!%p3331_p6), %s3958_s3, 1024, %s3335_s22, [#allocation11], %s3932_s25, %s3932_s25, %s3933_s24  }
  0x5a   : > { %s3959_s5 = sld [smem:[#allocation55_spill]] }
  0x60   : > { %s2628_s18 = scalar_lea.hbm %s3959_s5, 1024 }
  0x61   : > { %p2629_p11 = scmp.ne.s32.totalorder %s3959_s5, %s2628_s18  ;;  %p2635_p0 = scmp.lt.u32.totalorder %s2628_s18, %s3959_s5 }
  0x63   : > { %p2631_p12 = pnand %p2629_p11, %p3347_p8 }
  0x65   : > { %p2632_p13 = pneg %p2631_p12 }
  0x67   : > { %p2637_p2 = pnand %p2635_p0, %p2632_p13 }
  0x69   : > { %2640 = shalt.err (!%p2637_p2)
}
  0x6a   : > { %s2641_s1 = scalar_lea.vmem %s509_s0, 1024  ;;  %p2649_p5 = scmp.lt.s32.totalorder %s509_s0, %s509_s0 }
  0x6b   : > { %p2642_p4 = scmp.ne.s32.totalorder %s509_s0, %s2641_s1  ;;  %p2650_p10 = scmp.lt.s32.totalorder %s2641_s1, %s2641_s1 }
  0x6d   : > { %p2644_p7 = pnand %p2642_p4, %p3347_p8  ;;  %p2651_p3 = por %p2650_p10, %p2649_p5 }
  0x6f   : > { %p2645_p9 = pneg %p2644_p7 }
  0x71   : > { %p2652_p1 = pnand %p2651_p3, %p2645_p9 }
  0x73   : > { %2655 = shalt.err (!%p2652_p1)
}
  0x74   : > { %2345 = dma.hbm_to_vmem [thread:$0]  (!%p3331_p6), %s3959_s5, 1024, %s509_s0, [#allocation14], %s3932_s25, %s3932_s25, %s3933_s24  }
  0x75   : > { %s3171_s28 = smov [#allocation16]   ;;  %s3172_s27 = smov [#allocation19]  }
  0x76   : > { %s532_s29 = sshll.u32 %s3171_s28, 4  ;;  %s556_s18 = sshll.u32 %s3172_s27, 4  ;;  %s533_s29 = int_to_ptr.vmem [resolvable:$true] %s532_s29  ;;  %s557_s18 = int_to_ptr.vmem [resolvable:$true] %s556_s18 }
  0x77   : > { %s2656_s23 = scalar_lea.hbm %s3904_s7, 1024 }
  0x78   : > { %p2657_p1 = scmp.ne.s32.totalorder %s3904_s7, %s2656_s23  ;;  %p2663_p12 = scmp.lt.u32.totalorder %s2656_s23, %s3904_s7 }
  0x7a   : > { %p2659_p3 = pnand %p2657_p1, %p3347_p8 }
  0x7c   : > { %p2660_p11 = pneg %p2659_p3 }
  0x7e   : > { %p2665_p13 = pnand %p2663_p12, %p2660_p11 }
  0x80   : > { %2668 = shalt.err (!%p2665_p13)
}
  0x81   : > { %s2669_s0 = scalar_lea.vmem %s533_s29, 1024  ;;  %p2677_p7 = scmp.lt.s32.totalorder %s533_s29, %s533_s29 }
  0x82   : > { %p2670_p0 = scmp.ne.s32.totalorder %s533_s29, %s2669_s0  ;;  %p2678_p9 = scmp.lt.s32.totalorder %s2669_s0, %s2669_s0 }
  0x84   : > { %p2672_p2 = pnand %p2670_p0, %p3347_p8  ;;  %p2679_p5 = por %p2678_p9, %p2677_p7 }
  0x86   : > { %p2673_p4 = pneg %p2672_p2 }
  0x88   : > { %p2680_p10 = pnand %p2679_p5, %p2673_p4 }
  0x8a   : > { %2683 = shalt.err (!%p2680_p10)
}
  0x8b   : > { %2351 = dma.hbm_to_vmem [thread:$0]  (!%p3331_p6), %s3904_s7, 1024, %s533_s29, [#allocation17], %s3932_s25, %s3932_s25, %s3933_s24  }
  0x8c   : > { %s2684_s19 = scalar_lea.hbm %s3906_s9, 2048 }
  0x8d   : > { %p2685_p1 = scmp.ne.s32.totalorder %s3906_s9, %s2684_s19  ;;  %p2691_p12 = scmp.lt.u32.totalorder %s2684_s19, %s3906_s9 }
  0x8f   : > { %p2687_p3 = pnand %p2685_p1, %p3347_p8 }
  0x91   : > { %p2688_p11 = pneg %p2687_p3 }
  0x93   : > { %p2693_p13 = pnand %p2691_p12, %p2688_p11 }
  0x95   : > { %2696 = shalt.err (!%p2693_p13)
}
  0x96   : > { %s2697_s22 = scalar_lea.vmem %s557_s18, 2048  ;;  %p2705_p7 = scmp.lt.s32.totalorder %s557_s18, %s557_s18 }
  0x97   : > { %p2698_p0 = scmp.ne.s32.totalorder %s557_s18, %s2697_s22  ;;  %p2706_p9 = scmp.lt.s32.totalorder %s2697_s22, %s2697_s22 }
  0x99   : > { %p2700_p2 = pnand %p2698_p0, %p3347_p8  ;;  %p2707_p5 = por %p2706_p9, %p2705_p7 }
  0x9b   : > { %p2701_p4 = pneg %p2700_p2 }
  0x9d   : > { %p2708_p10 = pnand %p2707_p5, %p2701_p4 }
  0x9f   : > { %2711 = shalt.err (!%p2708_p10)
}
  0xa0   : > { %s3173_s29 = smov 128   ;;  %s3174_s0 = smov 8  }
  0xa1   : > { %2357 = dma.hbm_to_vmem [thread:$0]  (!%p3331_p6), %s3906_s9, 2048, %s557_s18, [#allocation20], %s3173_s29, %s3173_s29, %s3174_s0  }
  0xa2   : > { %s3175_s28 = smov [#allocation22]   ;;  %s3176_s19 = smov [#allocation25]  }
  0xa3   : > { %s580_s27 = sshll.u32 %s3175_s28, 4  ;;  %s605_s21 = sshll.u32 %s3176_s19, 4  ;;  %s581_s27 = int_to_ptr.vmem [resolvable:$true] %s580_s27  ;;  %s606_s21 = int_to_ptr.vmem [resolvable:$true] %s605_s21 }
  0xa4   : > { %s2712_s1 = scalar_lea.hbm %s3908_s11, 2048 }
  0xa5   : > { %p2713_p1 = scmp.ne.s32.totalorder %s3908_s11, %s2712_s1  ;;  %p2719_p12 = scmp.lt.u32.totalorder %s2712_s1, %s3908_s11 }
  0xa7   : > { %p2715_p3 = pnand %p2713_p1, %p3347_p8 }
  0xa9   : > { %p2716_p11 = pneg %p2715_p3 }
  0xab   : > { %p2721_p13 = pnand %p2719_p12, %p2716_p11 }
  0xad   : > { %2724 = shalt.err (!%p2721_p13)
}
  0xae   : > { %s2725_s18 = scalar_lea.vmem %s581_s27, 2048  ;;  %p2733_p7 = scmp.lt.s32.totalorder %s581_s27, %s581_s27 }
  0xaf   : > { %p2726_p0 = scmp.ne.s32.totalorder %s581_s27, %s2725_s18  ;;  %p2734_p9 = scmp.lt.s32.totalorder %s2725_s18, %s2725_s18 }
  0xb1   : > { %p2728_p2 = pnand %p2726_p0, %p3347_p8  ;;  %p2735_p5 = por %p2734_p9, %p2733_p7 }
  0xb3   : > { %p2729_p4 = pneg %p2728_p2 }
  0xb5   : > { %p2736_p10 = pnand %p2735_p5, %p2729_p4 }
  0xb7   : > { %2739 = shalt.err (!%p2736_p10)
}
  0xb8   : > { %s3960_s25 = smov 4   ;;  %s3961_s29 = smov 64  }
  0xb9   : > { %2363 = dma.hbm_to_vmem [thread:$0]  (!%p3331_p6), %s3908_s11, 2048, %s581_s27, [#allocation23], %s3961_s29, %s3961_s29, %s3960_s25  }
  0xba   : > { %s2740_s26 = scalar_lea.hbm %s3910_s13, 16 }
  0xbb   : > { %p2741_p1 = scmp.ne.s32.totalorder %s3910_s13, %s2740_s26  ;;  %p2747_p12 = scmp.lt.u32.totalorder %s2740_s26, %s3910_s13 }
  0xbd   : > { %p2743_p3 = pnand %p2741_p1, %p3347_p8 }
  0xbf   : > { %p2744_p11 = pneg %p2743_p3 }
  0xc1   : > { %p2749_p13 = pnand %p2747_p12, %p2744_p11 }
  0xc3   : > { %2752 = shalt.err (!%p2749_p13)
}
  0xc4   : > { %s2753_s1 = scalar_lea.vmem %s606_s21, 16  ;;  %s2760_s27 = scalar_lea.vmem %s606_s21, 32 }
  0xc5   : > { %p2754_p0 = scmp.ne.s32.totalorder %s606_s21, %s2753_s1  ;;  %p2761_p7 = scmp.lt.s32.totalorder %s606_s21, %s606_s21 }
  0xc6   : > { %p2762_p9 = scmp.lt.s32.totalorder %s2760_s27, %s2753_s1 }
  0xc7   : > { %p2756_p2 = pnand %p2754_p0, %p3347_p8 }
  0xc8   : > { %p2763_p5 = por %p2762_p9, %p2761_p7 }
  0xc9   : > { %p2757_p4 = pneg %p2756_p2 }
  0xcb   : > { %p2764_p10 = pnand %p2763_p5, %p2757_p4 }
  0xcd   : > { %2767 = shalt.err (!%p2764_p10)
}
  0xce   : > { %2369 = dma.hbm_to_vmem [thread:$0]  (!%p3331_p6), %s3910_s13, 16, %s606_s21, [#allocation26]  }
  0xcf   : > { %s3177_s25 = smov [#allocation28]   ;;  %s3178_s5 = smov [#allocation9]  }
  0xd0   : > { %s627_s29 = sshll.u32 %s3177_s25, 4  ;;  %s474_s24 = sshll.u32 %s3178_s5, 4  ;;  %s628_s29 = int_to_ptr.vmem [resolvable:$true] %s627_s29  ;;  %s475_s24 = int_to_ptr.vmem [resolvable:$true] %s474_s24 }
  0xd1   : > { %s2768_s26 = scalar_lea.hbm %s3912_s15, 16 }
  0xd2   : > { %p2769_p1 = scmp.ne.s32.totalorder %s3912_s15, %s2768_s26  ;;  %p2775_p12 = scmp.lt.u32.totalorder %s2768_s26, %s3912_s15 }
  0xd4   : > { %p2771_p3 = pnand %p2769_p1, %p3347_p8 }
  0xd6   : > { %p2772_p11 = pneg %p2771_p3 }
  0xd8   : > { %p2777_p13 = pnand %p2775_p12, %p2772_p11 }
  0xda   : > { %2780 = shalt.err (!%p2777_p13)
}
  0xdb   : > { %s2781_s21 = scalar_lea.vmem %s628_s29, 16  ;;  %s2788_s1 = scalar_lea.vmem %s628_s29, 32 }
  0xdc   : > { %p2782_p0 = scmp.ne.s32.totalorder %s628_s29, %s2781_s21  ;;  %p2789_p7 = scmp.lt.s32.totalorder %s628_s29, %s628_s29 }
  0xdd   : > { %p2790_p9 = scmp.lt.s32.totalorder %s2788_s1, %s2781_s21 }
  0xde   : > { %p2784_p2 = pnand %p2782_p0, %p3347_p8 }
  0xdf   : > { %p2791_p5 = por %p2790_p9, %p2789_p7 }
  0xe0   : > { %p2785_p4 = pneg %p2784_p2 }
  0xe2   : > { %p2792_p10 = pnand %p2791_p5, %p2785_p4 }
  0xe4   : > { %2795 = shalt.err (!%p2792_p10)
}
  0xe5   : > { %2375 = dma.hbm_to_vmem [thread:$0]  (!%p3331_p6), %s3912_s15, 16, %s628_s29, [#allocation29]  }
  0xe6   : > { %s3962_s2 = sld [smem:[#allocation52_spill]] }
  0xec   : > { %s2796_s5 = scalar_lea.hbm %s3962_s2, 16 }
  0xed   : > { %p2797_p1 = scmp.ne.s32.totalorder %s3962_s2, %s2796_s5  ;;  %p2803_p12 = scmp.lt.u32.totalorder %s2796_s5, %s3962_s2 }
  0xef   : > { %p2799_p3 = pnand %p2797_p1, %p3347_p8 }
  0xf1   : > { %p2800_p11 = pneg %p2799_p3 }
  0xf3   : > { %p2805_p13 = pnand %p2803_p12, %p2800_p11 }
  0xf5   : > { %2808 = shalt.err (!%p2805_p13)
}
  0xf6   : > { %s2809_s19 = scalar_lea.vmem %s475_s24, 16  ;;  %s2816_s29 = scalar_lea.vmem %s475_s24, 32 }
  0xf7   : > { %p2810_p0 = scmp.ne.s32.totalorder %s475_s24, %s2809_s19  ;;  %p2817_p7 = scmp.lt.s32.totalorder %s475_s24, %s475_s24 }
  0xf8   : > { %p2818_p9 = scmp.lt.s32.totalorder %s2816_s29, %s2809_s19 }
  0xf9   : > { %p2812_p2 = pnand %p2810_p0, %p3347_p8 }
  0xfa   : > { %p2819_p5 = por %p2818_p9, %p2817_p7 }
  0xfb   : > { %p2813_p4 = pneg %p2812_p2 }
  0xfd   : > { %p2820_p10 = pnand %p2819_p5, %p2813_p4 }
  0xff   : > { %2823 = shalt.err (!%p2820_p10)
}
 0x100   : > { %2336 = dma.hbm_to_vmem [thread:$0]  (!%p3331_p6), %s3962_s2, 16, %s475_s24, [#allocation8]  }
 0x101   : > { %s3179_s21 = smov [#allocation12]   ;;  %s3180_s27 = smov [#allocation15]  }
 0x102   : > { %s498_s1 = sshll.u32 %s3179_s21, 4  ;;  %s522_s22 = sshll.u32 %s3180_s27, 4  ;;  %s499_s1 = int_to_ptr.vmem [resolvable:$true] %s498_s1  ;;  %s523_s22 = int_to_ptr.vmem [resolvable:$true] %s522_s22 }
 0x103   : > { %s3963_s4 = sld [smem:[#allocation54_spill]] }
 0x109   : > { %s2824_s5 = scalar_lea.hbm %s3963_s4, 16 }
 0x10a   : > { %p2825_p1 = scmp.ne.s32.totalorder %s3963_s4, %s2824_s5  ;;  %p2831_p12 = scmp.lt.u32.totalorder %s2824_s5, %s3963_s4 }
 0x10c   : > { %p2827_p3 = pnand %p2825_p1, %p3347_p8 }
 0x10e   : > { %p2828_p11 = pneg %p2827_p3 }
 0x110   : > { %p2833_p13 = pnand %p2831_p12, %p2828_p11 }
 0x112   : > { %2836 = shalt.err (!%p2833_p13)
}
 0x113   : > { %s2837_s24 = scalar_lea.vmem %s499_s1, 16  ;;  %s2844_s19 = scalar_lea.vmem %s499_s1, 32 }
 0x114   : > { %p2838_p0 = scmp.ne.s32.totalorder %s499_s1, %s2837_s24  ;;  %p2845_p7 = scmp.lt.s32.totalorder %s499_s1, %s499_s1 }
 0x115   : > { %p2846_p9 = scmp.lt.s32.totalorder %s2844_s19, %s2837_s24 }
 0x116   : > { %p2840_p2 = pnand %p2838_p0, %p3347_p8 }
 0x117   : > { %p2847_p5 = por %p2846_p9, %p2845_p7 }
 0x118   : > { %p2841_p4 = pneg %p2840_p2 }
 0x11a   : > { %p2848_p10 = pnand %p2847_p5, %p2841_p4 }
 0x11c   : > { %2851 = shalt.err (!%p2848_p10)
}
 0x11d   : > { %2342 = dma.hbm_to_vmem [thread:$0]  (!%p3331_p6), %s3963_s4, 16, %s499_s1, [#allocation11]  }
 0x11e   : > { %s2852_s27 = scalar_lea.hbm %s3903_s6, 16 }
 0x11f   : > { %p2853_p1 = scmp.ne.s32.totalorder %s3903_s6, %s2852_s27  ;;  %p2859_p12 = scmp.lt.u32.totalorder %s2852_s27, %s3903_s6 }
 0x121   : > { %p2855_p3 = pnand %p2853_p1, %p3347_p8 }
 0x123   : > { %p2856_p11 = pneg %p2855_p3 }
 0x125   : > { %p2861_p13 = pnand %p2859_p12, %p2856_p11 }
 0x127   : > { %2864 = shalt.err (!%p2861_p13)
}
 0x128   : > { %s2865_s3 = scalar_lea.vmem %s523_s22, 16  ;;  %s2872_s1 = scalar_lea.vmem %s523_s22, 32 }
 0x129   : > { %p2866_p0 = scmp.ne.s32.totalorder %s523_s22, %s2865_s3  ;;  %p2873_p7 = scmp.lt.s32.totalorder %s523_s22, %s523_s22 }
 0x12a   : > { %p2874_p9 = scmp.lt.s32.totalorder %s2872_s1, %s2865_s3 }
 0x12b   : > { %p2868_p2 = pnand %p2866_p0, %p3347_p8 }
 0x12c   : > { %p2875_p5 = por %p2874_p9, %p2873_p7 }
 0x12d   : > { %p2869_p4 = pneg %p2868_p2 }
 0x12f   : > { %p2876_p10 = pnand %p2875_p5, %p2869_p4 }
 0x131   : > { %2879 = shalt.err (!%p2876_p10)
}
 0x132   : > { %2348 = dma.hbm_to_vmem [thread:$0]  (!%p3331_p6), %s3903_s6, 16, %s523_s22, [#allocation14]  }
 0x133   : > { %s3181_s24 = smov [#allocation18]   ;;  %s3182_s29 = smov [#allocation21]  }
 0x134   : > { %s546_s19 = sshll.u32 %s3181_s24, 4  ;;  %s570_s23 = sshll.u32 %s3182_s29, 4  ;;  %s547_s19 = int_to_ptr.vmem [resolvable:$true] %s546_s19  ;;  %s571_s23 = int_to_ptr.vmem [resolvable:$true] %s570_s23 }
 0x135   : > { %s2880_s27 = scalar_lea.hbm %s3905_s8, 16 }
 0x136   : > { %p2881_p1 = scmp.ne.s32.totalorder %s3905_s8, %s2880_s27  ;;  %p2887_p12 = scmp.lt.u32.totalorder %s2880_s27, %s3905_s8 }
 0x138   : > { %p2883_p3 = pnand %p2881_p1, %p3347_p8 }
 0x13a   : > { %p2884_p11 = pneg %p2883_p3 }
 0x13c   : > { %p2889_p13 = pnand %p2887_p12, %p2884_p11 }
 0x13e   : > { %2892 = shalt.err (!%p2889_p13)
}
 0x13f   : > { %s2893_s22 = scalar_lea.vmem %s547_s19, 16  ;;  %s2900_s3 = scalar_lea.vmem %s547_s19, 32 }
 0x140   : > { %p2894_p0 = scmp.ne.s32.totalorder %s547_s19, %s2893_s22  ;;  %p2901_p7 = scmp.lt.s32.totalorder %s547_s19, %s547_s19 }
 0x141   : > { %p2902_p9 = scmp.lt.s32.totalorder %s2900_s3, %s2893_s22 }
 0x142   : > { %p2896_p2 = pnand %p2894_p0, %p3347_p8 }
 0x143   : > { %p2903_p5 = por %p2902_p9, %p2901_p7 }
 0x144   : > { %p2897_p4 = pneg %p2896_p2 }
 0x146   : > { %p2904_p10 = pnand %p2903_p5, %p2897_p4 }
 0x148   : > { %2907 = shalt.err (!%p2904_p10)
}
 0x149   : > { %2354 = dma.hbm_to_vmem [thread:$0]  (!%p3331_p6), %s3905_s8, 16, %s547_s19, [#allocation17]  }
 0x14a   : > { %s2908_s29 = scalar_lea.hbm %s3907_s10, 32 }
 0x14b   : > { %p2909_p1 = scmp.ne.s32.totalorder %s3907_s10, %s2908_s29  ;;  %p2915_p12 = scmp.lt.u32.totalorder %s2908_s29, %s3907_s10 }
 0x14d   : > { %p2911_p3 = pnand %p2909_p1, %p3347_p8 }
 0x14f   : > { %p2912_p11 = pneg %p2911_p3 }
 0x151   : > { %p2917_p13 = pnand %p2915_p12, %p2912_p11 }
 0x153   : > { %2920 = shalt.err (!%p2917_p13)
}
 0x154   : > { %s2921_s25 = scalar_lea.vmem %s571_s23, 32  ;;  %p2929_p7 = scmp.lt.s32.totalorder %s571_s23, %s571_s23 }
 0x155   : > { %p2922_p0 = scmp.ne.s32.totalorder %s571_s23, %s2921_s25  ;;  %p2930_p9 = scmp.lt.s32.totalorder %s2921_s25, %s2921_s25 }
 0x157   : > { %p2924_p2 = pnand %p2922_p0, %p3347_p8  ;;  %p2931_p5 = por %p2930_p9, %p2929_p7 }
 0x159   : > { %p2925_p4 = pneg %p2924_p2 }
 0x15b   : > { %p2932_p10 = pnand %p2931_p5, %p2925_p4 }
 0x15d   : > { %2935 = shalt.err (!%p2932_p10)
}
 0x15e   : > { %2360 = dma.hbm_to_vmem [thread:$0]  (!%p3331_p6), %s3907_s10, 32, %s571_s23, [#allocation20]  }
 0x15f   : > { %s3183_s0 = smov [#allocation24]   ;;  %s3184_s3 = smov [#allocation27]  }
 0x160   : > { %s594_s22 = sshll.u32 %s3183_s0, 4  ;;  %s616_s1 = sshll.u32 %s3184_s3, 4  ;;  %s595_s22 = int_to_ptr.vmem [resolvable:$true] %s594_s22  ;;  %s617_s1 = int_to_ptr.vmem [resolvable:$true] %s616_s1 }
 0x161   : > { %s2936_s24 = scalar_lea.hbm %s3909_s12, 16 }
 0x162   : > { %p2937_p1 = scmp.ne.s32.totalorder %s3909_s12, %s2936_s24  ;;  %p2943_p12 = scmp.lt.u32.totalorder %s2936_s24, %s3909_s12 }
 0x164   : > { %p2939_p3 = pnand %p2937_p1, %p3347_p8 }
 0x166   : > { %p2940_p11 = pneg %p2939_p3 }
 0x168   : > { %p2945_p13 = pnand %p2943_p12, %p2940_p11 }
 0x16a   : > { %2948 = shalt.err (!%p2945_p13)
}
 0x16b   : > { %s2949_s23 = scalar_lea.vmem %s595_s22, 16  ;;  %s2956_s18 = scalar_lea.vmem %s595_s22, 32 }
 0x16c   : > { %p2950_p0 = scmp.ne.s32.totalorder %s595_s22, %s2949_s23  ;;  %p2957_p7 = scmp.lt.s32.totalorder %s595_s22, %s595_s22 }
 0x16d   : > { %p2958_p9 = scmp.lt.s32.totalorder %s2956_s18, %s2949_s23 }
 0x16e   : > { %p2952_p2 = pnand %p2950_p0, %p3347_p8 }
 0x16f   : > { %p2959_p5 = por %p2958_p9, %p2957_p7 }
 0x170   : > { %p2953_p4 = pneg %p2952_p2 }
 0x172   : > { %p2960_p10 = pnand %p2959_p5, %p2953_p4 }
 0x174   : > { %2963 = shalt.err (!%p2960_p10)
}
 0x175   : > { %2366 = dma.hbm_to_vmem [thread:$0]  (!%p3331_p6), %s3909_s12, 16, %s595_s22, [#allocation23]  }
 0x176   : > { %s2964_s3 = scalar_lea.hbm %s3911_s14, 16 }
 0x177   : > { %p2965_p1 = scmp.ne.s32.totalorder %s3911_s14, %s2964_s3  ;;  %p2971_p12 = scmp.lt.u32.totalorder %s2964_s3, %s3911_s14 }
 0x179   : > { %p2967_p3 = pnand %p2965_p1, %p3347_p8 }
 0x17b   : > { %p2968_p11 = pneg %p2967_p3 }
 0x17d   : > { %p2973_p13 = pnand %p2971_p12, %p2968_p11 }
 0x17f   : > { %2976 = shalt.err (!%p2973_p13)
}
 0x180   : > { %s2977_s17 = scalar_lea.vmem %s617_s1, 16  ;;  %s2984_s22 = scalar_lea.vmem %s617_s1, 32 }
 0x181   : > { %p2978_p0 = scmp.ne.s32.totalorder %s617_s1, %s2977_s17  ;;  %p2985_p7 = scmp.lt.s32.totalorder %s617_s1, %s617_s1 }
 0x182   : > { %p2986_p9 = scmp.lt.s32.totalorder %s2984_s22, %s2977_s17 }
 0x183   : > { %p2980_p2 = pnand %p2978_p0, %p3347_p8 }
 0x184   : > { %p2987_p5 = por %p2986_p9, %p2985_p7 }
 0x185   : > { %p2981_p4 = pneg %p2980_p2 }
 0x187   : > { %p2988_p10 = pnand %p2987_p5, %p2981_p4 }
 0x189   : > { %2991 = shalt.err (!%p2988_p10)
}
 0x18a   : > { %2372 = dma.hbm_to_vmem [thread:$0]  (!%p3331_p6), %s3911_s14, 16, %s617_s1, [#allocation26]  }
 0x18b   : > { %s3185_s23 = smov [#allocation30]   ;;  %s3964_s5 = sld [smem:[#allocation56_spill]] }
 0x18c   : > { %s638_s18 = sshll.u32 %s3185_s23, 4  ;;  %s639_s18 = int_to_ptr.vmem [resolvable:$true] %s638_s18 }
 0x191   : > { %s2992_s0 = scalar_lea.hbm %s3964_s5, 16 }
 0x192   : > { %p2993_p1 = scmp.ne.s32.totalorder %s3964_s5, %s2992_s0  ;;  %p2999_p12 = scmp.lt.u32.totalorder %s2992_s0, %s3964_s5 }
 0x194   : > { %p2995_p3 = pnand %p2993_p1, %p3347_p8 }
 0x196   : > { %p2996_p11 = pneg %p2995_p3 }
 0x198   : > { %p3001_p13 = pnand %p2999_p12, %p2996_p11 }
 0x19a   : > { %3004 = shalt.err (!%p3001_p13)
}
 0x19b   : > { %s3005_s1 = scalar_lea.vmem %s639_s18, 16  ;;  %s3012_s29 = scalar_lea.vmem %s639_s18, 32 }
 0x19c   : > { %p3006_p0 = scmp.ne.s32.totalorder %s639_s18, %s3005_s1  ;;  %p3013_p7 = scmp.lt.s32.totalorder %s639_s18, %s639_s18 }
 0x19d   : > { %p3014_p9 = scmp.lt.s32.totalorder %s3012_s29, %s3005_s1 }
 0x19e   : > { %p3008_p2 = pnand %p3006_p0, %p3347_p8 }
 0x19f   : > { %p3015_p5 = por %p3014_p9, %p3013_p7 }
 0x1a0   : > { %p3009_p4 = pneg %p3008_p2 }
 0x1a2   : > { %p3016_p10 = pnand %p3015_p5, %p3009_p4 }
 0x1a4   : > { %3019 = shalt.err (!%p3016_p10)
}
 0x1a5   : > { %s3965_s21 = sld [smem:[#allocation47_spill]]  ;;  %s3966_s27 = sld [smem:[#allocation46_spill]] }
 0x1a6   : > { %s3967_s23 = sld [smem:[#allocation44_spill]]  ;;  %s3968_s25 = sld [smem:[#allocation43_spill]] }
 0x1a7   : > { %s3969_s30 = sld [smem:[#allocation42_spill]]  ;;  %s3970_s19 = sld [smem:[#allocation48_spill]] }
 0x1a8   : > { %2378 = dma.hbm_to_vmem [thread:$0]  (!%p3331_p6), %s3964_s5, 16, %s639_s18, [#allocation29]  }
 0x1ab   : > { %s1990_s0 = sadd.s32 4294967294, %s3965_s21   ;;  %s53_s3 = sadd.s32 1, %s3966_s27 }
 0x1ac   : > { %p55_p8 = scmp.ge.s32.totalorder %s53_s3, 2  ;;  %s60_s20 = sadd.s32 1, %s3967_s23 }
 0x1ad   : > { %p67_p1 = scmp.ne.s32.totalorder %s3967_s23, %s3968_s25  ;;  %p68_p3 = scmp.eq.s32.totalorder %s3965_s21, 0 }
 0x1ae   : > { %s4000_s3 = smov (%p55_p8, %s53_s3), 0  ;;  %p73_p12 = scmp.ne.s32.totalorder %s3968_s25, %s3969_s30 }
 0x1af   : > { %p3667_p11 = por %p68_p3, %p67_p1  ;;  %s57_s18 = ssub.s32 %s3966_s27, %s4000_s3 }
 0x1b0   : > { %s3972_s28 = sadd.s32 4294967295, %s3965_s21   ;;  %p58_p13 = scmp.eq.s32.totalorder %s57_s18, 0 }
 0x1b1   : > { %p435_p6 = scmp.eq.s32.totalorder %s3972_s28, 1  ;;  %p3973_p0 = scmp.ne.s32.totalorder %s3970_s19, 0 }
 0x1b2   : > { %p441_p7 = scmp.eq.s32.totalorder %s1990_s0, 1  ;;  %p2403_p5 = scmp.lt.s32.totalorder %s3965_s21, 2 }
 0x1b3   : > { %p3679_p2 = por %p3973_p0, %p73_p12  ;;  %p3683_p4 = por %p435_p6, %p67_p1 }
 0x1b4   : > { %s3688_s29 = scalar_select %p58_p13, %s3967_s23, %s60_s20  }
 0x1b5   : > { %s3975_s1 = scalar_select %p3683_p4, 1, 0 }
 0x1b6   : > { %p3690_p9 = por %p441_p7, %p73_p12  ;;  %s649_s22 = sand.u32 1, %s3967_s23  }
 0x1b7   : > { %s2010_s25 = sshll.u32 %s3966_s27, 7  ;;  %s2009_s30 = sshll.u32 %s649_s22, 3 }
 0x1b8   : > { %s3976_s17 = scalar_select %p3690_p9, 1, 0 }
 0x1b9   : > { %s3977_s28 = sld [smem:[#allocation50_spill]]  ;;  %s653_s0 = scalar_lea.vmem [#allocation4], %s2009_s30 }
 0x1ba   : > { %s660_s20 = sshll.u32 %s653_s0, 4  ;;  %p3704_p10 = pnand %p2403_p5, %p3667_p11  ;;  %s3708_s20 = int_to_ptr.vmem [resolvable:$true] %s660_s20 }
 0x1bb   : > { %s650_s21 = scalar_lea.sflag [#allocation5], %s649_s22 }
 0x1bc   : > { %p3022_p1 = pneg %p3704_p10 }
 0x1bf   : > { %s3978_s2 = smov %s3977_s28  ;;  %s3700_s4 = scalar_lea.hbm %s3977_s28, %s2010_s25 }
 0x1c0   : > { %s3020_s27 = scalar_lea.hbm %s3700_s4, 128  ;;  %s3025_s26 = scalar_lea.hbm %s3978_s2, 256 }
 0x1c1   : > { %p3021_p8 = scmp.ne.s32.totalorder %s3700_s4, %s3020_s27  ;;  %p3026_p11 = scmp.lt.u32.totalorder %s3700_s4, %s3978_s2 }
 0x1c2   : > { %p3027_p6 = scmp.lt.u32.totalorder %s3025_s26, %s3020_s27  ;;  %p3029_p0 = scmp.lt.u32.totalorder %s3020_s27, %s3700_s4 }
 0x1c3   : > { %p3023_p3 = pnand %p3022_p1, %p3021_p8 }
 0x1c4   : > { %p3028_p13 = por %p3027_p6, %p3026_p11 }
 0x1c5   : > { %p3024_p12 = pneg %p3023_p3 }
 0x1c6   : > { %p3030_p7 = por %p3029_p0, %p3028_p13 }
 0x1c8   : > { %p3031_p5 = pnand %p3030_p7, %p3024_p12 }
 0x1ca   : > { %3034 = shalt.err (!%p3031_p5)
}
 0x1cb   : > { %s3035_s22 = scalar_lea.vmem %s3708_s20, 128  ;;  %s3186_s18 = smov [#allocation4]  }
 0x1cc   : > { %p3036_p8 = scmp.ne.s32.totalorder %s3708_s20, %s3035_s22  ;;  %s3040_s28 = sshll.u32 %s3186_s18, 4  ;;  %s3041_s28 = int_to_ptr.vmem [resolvable:$false] %s3040_s28 }
 0x1cd   : > { %s3042_s0 = scalar_lea.vmem %s3041_s28, 256  ;;  %p3043_p4 = scmp.lt.s32.totalorder %s3708_s20, %s3041_s28 }
 0x1ce   : > { %p3038_p3 = pnand %p3036_p8, %p3022_p1  ;;  %p3044_p11 = scmp.lt.s32.totalorder %s3042_s0, %s3035_s22 }
 0x1d0   : > { %p3039_p9 = pneg %p3038_p3  ;;  %p3045_p6 = por %p3044_p11, %p3043_p4 }
 0x1d2   : > { %p3046_p13 = pnand %p3045_p6, %p3039_p9 }
 0x1d4   : > { %3049 = shalt.err (!%p3046_p13)
}
 0x1d5   : > { %2382 = dma.hbm_to_vmem [thread:$0]  (!%p3704_p10), %s3700_s4, 128, %s3708_s20, %s650_s21  }
 0x1d6   : > { %s3980_s27 = sld [smem:[#allocation49_spill]] }
 0x1dc   : > { %p3981_p12 = scmp.ne.s32.totalorder %s3980_s27, 0 }
 0x1dd   : > { %s3982_s23 = sld [smem:[#allocation43_spill]] (!%p3981_p12) }
 0x1de   : > { %669 = sbr.rel (%p3981_p12) target bundleno = 2829 (0xb0d), region = 88 }
 0x1e3   : > { %s3738_s25 = sand.u32 (!%p3981_p12), 1, %s3982_s23  }
 0x1e4   : > { %s2012_s26 = sshll.u32 (!%p3981_p12), %s3738_s25, 3  ;;  %s672_s30 = scalar_lea.sflag (!%p3981_p12), [#allocation5], %s3738_s25 }
 0x1e5   : > { %s3744_s19 = scalar_lea.vmem [#allocation4], %s2012_s26 }
 0x1e6   : > { %3103 = dma.done.wait (%p3679_p2), %s672_s30, 128  }
 0x1e7   : > { %3105 = vsyncadd (%p3679_p2), %s672_s30, 4294967168  ;;  %s3983_s4 = sld [smem:[#allocation48_spill]] }
 0x1ed   : > { %p3984_p4 = scmp.ne.s32.totalorder %s3983_s4, 0 }
 0x1ef   : > { %3107 = dma.done.wait (%p3984_p4), [#allocation8], 1040  }
 0x1f0   : > { %3109 = vsyncadd (%p3984_p4), [#allocation8], 4294966256 }
 0x1f1   : > { %3111 = dma.done.wait (%p3984_p4), [#allocation11], 1040  }
 0x1f2   : > { %3113 = vsyncadd (%p3984_p4), [#allocation11], 4294966256 }
 0x1f3   : > { %3115 = dma.done.wait (%p3984_p4), [#allocation14], 1040  }
 0x1f4   : > { %3117 = vsyncadd (%p3984_p4), [#allocation14], 4294966256 }
 0x1f5   : > { %3119 = dma.done.wait (%p3984_p4), [#allocation17], 1040  }
 0x1f6   : > { %3121 = vsyncadd (%p3984_p4), [#allocation17], 4294966256 }
 0x1f7   : > { %3123 = dma.done.wait (%p3984_p4), [#allocation20], 2080  }
 0x1f8   : > { %3125 = vsyncadd (%p3984_p4), [#allocation20], 4294965216 }
 0x1f9   : > { %3127 = dma.done.wait (%p3984_p4), [#allocation23], 2064  }
 0x1fa   : > { %3129 = vsyncadd (%p3984_p4), [#allocation23], 4294965232 }
 0x1fb   : > { %3131 = dma.done.wait (%p3984_p4), [#allocation26], 32  }
 0x1fc   : > { %3133 = vsyncadd (%p3984_p4), [#allocation26], 4294967264 }
 0x1fd   : > { %3135 = dma.done.wait (%p3984_p4), [#allocation29], 32  }
 0x1fe   : > { %3137 = vsyncadd (%p3984_p4), [#allocation29], 4294967264  ;;  %v3187_v0 = vmov 0.0   ;;  %vm3188_vm0 = vmmov 0   ;;  %v2492_v1 = vld [vmem:[#allocation10] sm:$0xff]   ;;  %v2493_v2 = vld [vmem:[#allocation10 + $0x8] sm:$0xff]  }
 0x1ff   : > { %2170 = vmatprep.subr.bf16.mxu0 %v3187_v0  ;;  %2186 = vmatprep.mubr.msk.bf16.mxu0 %vm3188_vm0, %v3187_v0  ;;  %v2494_v3 = vld [vmem:[#allocation10 + $0x10] sm:$0xff]   ;;  %v2495_v4 = vld [vmem:[#allocation10 + $0x18] sm:$0xff]   ;;  %v2496_v5 = vld [vmem:[#allocation10 + $0x20] sm:$0xff]   ;;  %vm1181_vm1 = vcmask 64512   ;;  %vm1198_vm2 = vcmask 1043456   ;;  %s3985_s5 = sld [smem:[#allocation45_spill]] }
 0x200   : > { %2190 = vmatprep.subr.bf16.mxu1 %v3187_v0  ;;  %2206 = vmatprep.mubr.msk.bf16.mxu1 %vm3188_vm0, %v3187_v0  ;;  %v2497_v6 = vld [vmem:[#allocation10 + $0x28] sm:$0xff]   ;;  %v2498_v7 = vld [vmem:[#allocation10 + $0x30] sm:$0xff]   ;;  %v2499_v8 = vld [vmem:[#allocation10 + $0x38] sm:$0xff]   ;;  %s789_s20 = scalar_lea.vmem [#allocation31], %s2012_s26  ;;  %s3986_s28 = sld [smem:[#allocation57_spill]] }
 0x201   : > { %2171 = vmatpush3.bf16.msra.mxu0 %v2492_v1  ;;  %v3795_v9 = vld [vmem:[%s3744_s19] sm:$0xff]  ;;  %v2500_v10 = vld [vmem:[#allocation7] sm:$0xff]   ;;  %v2501_v12 = vld [vmem:[#allocation7 + $0x8] sm:$0xff]   ;;  %s1756_s21 = sshll.u32 %s789_s20, 4  ;;  %s1742_s23 = scalar_lea.sflag [#allocation6], %s3738_s25  ;;  %s3850_s21 = int_to_ptr.vmem [resolvable:$true] %s1756_s21 }
 0x202   : > { %2172 = vmatprep.subr.bf16.mxu0 %v3187_v0  ;;  %v3800_v11 = vpack.c.bf16 %v3795_v9, %v3795_v9  ;;  %v2502_v13 = vld [vmem:[#allocation7 + $0x10] sm:$0xff]   ;;  %v2503_v14 = vld [vmem:[#allocation7 + $0x18] sm:$0xff]   ;;  %v2504_v15 = vld [vmem:[#allocation7 + $0x20] sm:$0xff]   ;;  %s3050_s30 = scalar_lea.vmem %s3850_s21, 128  ;;  %p3988_p9 = scmp.ne.s32.totalorder %s3975_s1, 0 }
 0x203   : > { %v2505_v16 = vld [vmem:[#allocation7 + $0x28] sm:$0xff]   ;;  %v2506_v17 = vld [vmem:[#allocation7 + $0x30] sm:$0xff]   ;;  %v2507_v18 = vld [vmem:[#allocation7 + $0x38] sm:$0xff]   ;;  %p3051_p2 = scmp.ne.s32.totalorder %s3850_s21, %s3050_s30  ;;  %s3190_s26 = smov [#allocation31]  }
 0x204   : > { %v2030_v19 = vld [vmem:[#allocation12] ss:$0 sm:$0xff]  ;;  %v2048_v27 = vld [vmem:[#allocation9] ss:$0 sm:$0xff]  ;;  %v2508_v35 = vld [vmem:[#allocation13] sm:$0xff]   ;;  %s3054_s19 = sshll.u32 %s3190_s26, 4  ;;  %s3055_s19 = int_to_ptr.vmem [resolvable:$false] %s3054_s19 }
 0x205   : > { %2173 = vmatpush3.bf16.msra.mxu0 %v2493_v2  ;;  %2191 = vmatpush3.bf16.msra.mxu1 %v2508_v35  ;;  %v2509_v36 = vld [vmem:[#allocation13 + $0x8] sm:$0xff]   ;;  %v2510_v37 = vld [vmem:[#allocation13 + $0x10] sm:$0xff]   ;;  %v2511_v38 = vld [vmem:[#allocation13 + $0x18] sm:$0xff]   ;;  %s2105_s24 = sshll.u32 %s3985_s5, 7  ;;  %p3052_p10 = pnand %p3051_p2, %p3988_p9 }
 0x206   : > { %2174 = vmatprep.subr.bf16.mxu0 %v3187_v0  ;;  %2192 = vmatprep.subr.bf16.mxu1 %v3187_v0  ;;  %v2512_v39 = vld [vmem:[#allocation13 + $0x20] sm:$0xff]   ;;  %v2513_v40 = vld [vmem:[#allocation13 + $0x28] sm:$0xff]   ;;  %v2514_v41 = vld [vmem:[#allocation13 + $0x30] sm:$0xff]   ;;  %s3987_s0 = smov %s3986_s28  ;;  %s3848_s27 = scalar_lea.hbm %s3986_s28, %s2105_s24 }
 0x207   : > { %v2515_v42 = vld [vmem:[#allocation13 + $0x38] sm:$0xff]   ;;  %v2039_v48 = vld [vmem:[#allocation15] ss:$0 sm:$0xff]  ;;  %v2516_v2 = vld [vmem:[#allocation16] sm:$0xff]   ;;  %p3053_p1 = pneg %p3052_p10  ;;  %s3056_s4 = scalar_lea.vmem %s3055_s19, 256 }
 0x208   : > { %v2536_v35 = vld [vmem:[#allocation19 + $0x40] ss:$8 sps:$4 sm:$0xff]   ;;  %p3057_p0 = scmp.lt.s32.totalorder %s3850_s21, %s3055_s19  ;;  %p3058_p7 = scmp.lt.s32.totalorder %s3056_s4, %s3050_s30 }
 0x209   : > { %2175 = vmatpush3.bf16.msra.mxu0 %v2494_v3  ;;  %2193 = vmatpush3.bf16.msra.mxu1 %v2509_v36  ;;  %v2541_v36 = vld [vmem:[#allocation19 + $0x54] ss:$8 sps:$4 sm:$0xff]  }
 0x20a   : > { %2176 = vmatprep.subr.bf16.mxu0 %v3187_v0  ;;  %2194 = vmatprep.subr.bf16.mxu1 %v3187_v0  ;;  %p3059_p5 = por %p3058_p7, %p3057_p0 }
 0x20c   : > { %p3060_p8 = pnand %p3059_p5, %p3053_p1 }
 0x20d   : > { %2177 = vmatpush3.bf16.msra.mxu0 %v2495_v4  ;;  %2195 = vmatpush3.bf16.msra.mxu1 %v2510_v37  ;;  %v2517_v4 = vld [vmem:[#allocation16 + $0x8] sm:$0xff]   ;;  %v2539_v37 = vld [vmem:[#allocation19 + $0x50] ss:$8 sps:$4 sm:$0xff]  }
 0x20e   : > { %2178 = vmatprep.subr.bf16.mxu0 %v3187_v0  ;;  %2196 = vmatprep.subr.bf16.mxu1 %v3187_v0 }
 0x211   : > { %2179 = vmatpush3.bf16.msra.mxu0 %v2496_v5  ;;  %2197 = vmatpush3.bf16.msra.mxu1 %v2511_v38  ;;  %v2518_v5 = vld [vmem:[#allocation16 + $0x10] sm:$0xff]  }
 0x212   : > { %2180 = vmatprep.subr.bf16.mxu0 %v3187_v0  ;;  %2198 = vmatprep.subr.bf16.mxu1 %v3187_v0  ;;  %v2544_v38 = vld [vmem:[#allocation19 + $0x64] ss:$8 sps:$4 sm:$0xff]  }
 0x215   : > { %2181 = vmatpush3.bf16.msra.mxu0 %v2497_v6  ;;  %2199 = vmatpush3.bf16.msra.mxu1 %v2512_v39  ;;  %v2519_v6 = vld [vmem:[#allocation16 + $0x18] sm:$0xff]   ;;  %v2542_v39 = vld [vmem:[#allocation19 + $0x60] ss:$8 sps:$4 sm:$0xff]  }
 0x216   : > { %2182 = vmatprep.subr.bf16.mxu0 %v3187_v0  ;;  %2200 = vmatprep.subr.bf16.mxu1 %v3187_v0 }
 0x219   : > { %2183 = vmatpush3.bf16.msra.mxu0 %v2498_v7  ;;  %2201 = vmatpush3.bf16.msra.mxu1 %v2513_v40  ;;  %v2520_v7 = vld [vmem:[#allocation16 + $0x20] sm:$0xff]  }
 0x21a   : > { %2184 = vmatprep.subr.bf16.mxu0 %v3187_v0  ;;  %2202 = vmatprep.subr.bf16.mxu1 %v3187_v0  ;;  %v2547_v40 = vld [vmem:[#allocation19 + $0x74] ss:$8 sps:$4 sm:$0xff]  }
 0x21d   : > { %2185 = vmatpush3.bf16.msra.mxu0 %v2499_v8  ;;  %2203 = vmatpush3.bf16.msra.mxu1 %v2514_v41  ;;  %v2521_v8 = vld [vmem:[#allocation16 + $0x28] sm:$0xff]   ;;  %v2545_v41 = vld [vmem:[#allocation19 + $0x70] ss:$8 sps:$4 sm:$0xff]  }
 0x21e   : > { %2210 = vmatprep.subr.bf16.mxu0 %v3187_v0  ;;  %2204 = vmatprep.subr.bf16.mxu1 %v3187_v0 }
 0x220   : > { %2187 = vmatmul.mubr.bf16.vlgmr.msra.gmra.mrb[0].mxu0 %v3800_v11 }
 0x221   : > { %2211 = vmatpush3.bf16.msra.mxu0 %v2500_v10  ;;  %2226 = vmatprep.mubr.msk.bf16.mxu0 %vm3188_vm0, %v3187_v0  ;;  %v2522_v10 = vld [vmem:[#allocation16 + $0x30] sm:$0xff]  }
 0x222   : > { %2212 = vmatprep.subr.bf16.mxu0 %v3187_v0  ;;  %2205 = vmatpush3.bf16.msra.mxu1 %v2515_v42  ;;  %v3189_v42 = vmov 0  }
 0x223   : > { %2236 = vmatprep.subr.bf16.mxu1 %v3187_v0 }
 0x225   : > { %2213 = vmatpush3.bf16.msra.mxu0 %v2501_v12  ;;  %2207 = vmatmul.mubr.bf16.vlgmr.msra.gmra.mrb[0].mxu1 %v3800_v11 }
 0x226   : > { %2214 = vmatprep.subr.bf16.mxu0 %v3187_v0  ;;  %2238 = vmatprep.mubr.msk.bf16.mxu1 %vm3188_vm0, %v3187_v0 }
 0x229   : > { %2215 = vmatpush3.bf16.msra.mxu0 %v2502_v13 }
 0x22a   : > { %2216 = vmatprep.subr.bf16.mxu0 %v3187_v0 }
 0x22d   : > { %2217 = vmatpush3.bf16.msra.mxu0 %v2503_v14 }
 0x22e   : > { %2218 = vmatprep.subr.bf16.mxu0 %v3187_v0 }
 0x231   : > { %2219 = vmatpush3.bf16.msra.mxu0 %v2504_v15 }
 0x232   : > { %2220 = vmatprep.subr.bf16.mxu0 %v3187_v0 }
 0x235   : > { %2221 = vmatpush3.bf16.msra.mxu0 %v2505_v16 }
 0x236   : > { %2222 = vmatprep.subr.bf16.mxu0 %v3187_v0 }
 0x239   : > { %2223 = vmatpush3.bf16.msra.mxu0 %v2506_v17  ;;  %v2058_v17 = vld [vmem:[#allocation18] ss:$0 sm:$0xff] }
 0x23a   : > { %2224 = vmatprep.subr.bf16.mxu0 %v3187_v0 }
 0x23d   : > { %2225 = vmatpush3.bf16.msra.mxu0 %v2507_v18 }
 0x23e   : > { %2230 = vmatprep.subr.bf16.mxu0 %v3187_v0 }
 0x240   : > { %2227 = vmatmul.mubr.bf16.vlgmr.msra.gmra.mrb[4].mxu0 %v3800_v11  ;;  %v2523_v11 = vld [vmem:[#allocation16 + $0x38] sm:$0xff]  }
 0x241   : > { %2232 = vmatprep.mubr.msk.bf16.mxu0 %vm3188_vm0, %v3187_v0 }
 0x2f3   : > { %v902_v20 = vpop.f32.mrb[0].mxu0 }
 0x2f4   : > { %v903_v21 = vadd.f32 %v2030_v19, %v902_v20  ;;  %v2188_v22 = vpop.f32.mrb[1].mxu0 }
 0x2f5   : > { %v905_v23 = vpop.f32.mrb[2].mxu0 }
 0x2f6   : > { %v1019_v24 = vpack.c.bf16 %v903_v21, %v903_v21  ;;  %v2189_v25 = vpop.f32.mrb[3].mxu0 }
 0x2f7   : > { %v2526_v25 = vld [vmem:[#allocation19 + $0x4] ss:$8 sps:$4 sm:$0xff]  }
 0x2f8   : > { %1020 = vst [vmem:[#allocation2] sm:$0xf] %v1019_v24  ;;  %v1013_v49 = vpop.f32.mrb[0].mxu1  ;;  %v2524_v24 = vld [vmem:[#allocation19] ss:$8 sps:$4 sm:$0xff]  }
 0x2f9   : > { %v1014_v50 = vadd.f32 %v2039_v48, %v1013_v49  ;;  %v2208_v51 = vpop.f32.mrb[1].mxu1  ;;  %v2553_v48 = vld [vmem:[#allocation22 + $0x10] sm:$0xff]   ;;  %v2554_v49 = vld [vmem:[#allocation22 + $0x58] sm:$0xff]  }
 0x2fa   : > { %v1016_v52 = vpop.f32.mrb[2].mxu1  ;;  %v2556_v51 = vld [vmem:[#allocation22 + $0x60] sm:$0xff]  }
 0x2fb   : > { %v1021_v53 = vpack.c.bf16 %v1014_v50, %v1014_v50  ;;  %v2209_v54 = vpop.f32.mrb[3].mxu1  ;;  %v2555_v50 = vld [vmem:[#allocation22 + $0x18] sm:$0xff]   ;;  %v2557_v52 = vld [vmem:[#allocation22 + $0x20] sm:$0xff]  }
 0x2fc   : > { %v2559_v54 = vld [vmem:[#allocation22 + $0x28] sm:$0xff]  }
 0x2fd   : > { %1022 = vst [vmem:[#allocation3] sm:$0xf] %v1021_v53  ;;  %v2558_v53 = vld [vmem:[#allocation22 + $0x68] sm:$0xff]  }
 0x2ff   : > { %v1140_v26 = vld [vmem:[#allocation2] sm:$0xf] }
 0x300   : > { %2231 = vmatpush3.bf16.xpose.msra.mxu0 %v1140_v26  ;;  %v2527_v26 = vld [vmem:[#allocation19 + $0x10] ss:$8 sps:$4 sm:$0xff]  }
 0x301   : > { %1492 = vmatprep.subr.bf16.mxu0 %v2526_v25  ;;  %v2085_v25 = vld [vmem:[#allocation24] ss:$0 sm:$0xff] }
 0x304   : > { %v1194_v60 = vld [vmem:[#allocation3] sm:$0xf] }
 0x305   : > { %v1200_v61 = vsel %vm1198_vm2, %v1194_v60, 0 }
 0x306   : > { %2237 = vmatpush3.bf16.msra.mxu1 %v1200_v61  ;;  %v2068_v61 = vld [vmem:[#allocation27] ss:$0 sm:$0xff] }
 0x307   : > { %2242 = vmatprep.subr.bf16.mxu1 %v3187_v0 }
 0x313   : > { %v1132_v28 = vpop.f32.mrb[4].mxu0 }
 0x314   : > { %v1133_v29 = vadd.f32 %v2048_v27, %v1132_v28  ;;  %v2228_v30 = vpop.f32.mrb[5].mxu0  ;;  %v2532_v27 = vld [vmem:[#allocation19 + $0x24] ss:$8 sps:$4 sm:$0xff]   ;;  %v2530_v28 = vld [vmem:[#allocation19 + $0x20] ss:$8 sps:$4 sm:$0xff]  }
 0x315   : > { %v1135_v31 = vpop.f32.mrb[6].mxu0 }
 0x316   : > { %v1138_v32 = vmul.f32 0.17677669, %v1133_v29  ;;  %v2229_v33 = vpop.f32.mrb[7].mxu0 }
 0x317   : > { %v2535_v33 = vld [vmem:[#allocation19 + $0x34] ss:$8 sps:$4 sm:$0xff]  }
 0x318   : > { %v1139_v34 = vpack.c.bf16 %v1138_v32, %v1138_v32 }
 0x31a   : > { %2233 = vmatmul.mubr.bf16.vlgmr.msra.gmra.mrb[8].mxu0 %v1139_v34  ;;  %v2538_v34 = vld [vmem:[#allocation19 + $0x44] ss:$8 sps:$4 sm:$0xff]  }
 0x31b   : > { %1493 = vmatpush1.bf16.msra.mxu0 %v2524_v24  ;;  %1524 = vmatprep.mubr.bf16.mxu0 %v3189_v42 }
 0x3ed   : > { %v1175_v43 = vpop.f32.mrb[8].mxu0 }
 0x3ee   : > { %v2234_v44 = vpop.f32.mrb[9].mxu0  ;;  %v1182_v45 = vsel %vm1181_vm1, %v1175_v43, -inf }
 0x3ef   : > { %1183 = vmax.xlane.f32.xlu0 %v1182_v45  ;;  %v1178_v46 = vpop.f32.mrb[10].mxu0  ;;  %v2549_v44 = vld [vmem:[#allocation22] sm:$0xff]   ;;  %v2550_v45 = vld [vmem:[#allocation22 + $0x48] sm:$0xff]  }
 0x3f0   : > { %v2235_v47 = vpop.f32.mrb[11].mxu0  ;;  %v2551_v46 = vld [vmem:[#allocation22 + $0x8] sm:$0xff]  }
 0x3f1   : > { %v2552_v47 = vld [vmem:[#allocation22 + $0x50] sm:$0xff]  }
 0x47c   : > { %v1184_v55 = vpop.xlane.xlu0 %1183 }
 0x47d   : > { %v1185_v56 = vsub.f32 %v1175_v43, %v1184_v55  ;;  %v2548_v43 = vld [vmem:[#allocation22 + $0x40] sm:$0xff]  }
 0x47f   : > { %v1186_v57 = vmul.f32 1.442695, %v1185_v56 }
 0x481   : > { %2564 = vpow2.f32 %v1186_v57 }
 0x48b   : > { %v2565_v58 = vpop.eup %2564 }
 0x48c   : > { %v1188_v59 = vsel %vm1181_vm1, %v2565_v58, 0.0 }
 0x48d   : > { %1189 = vadd.xlane.f32.xlu0 %v1188_v59  ;;  %v2067_v59 = vld [vmem:[#allocation25] ss:$0 sm:$0xff] }
 0x51a   : > { %v1190_v62 = vpop.xlane.xlu0 %1189 }
 0x51b   : > { %2566 = vrcp.f32 %v1190_v62 }
 0x525   : > { %v2567_v63 = vpop.eup %2566 }
 0x526   : > { %v1192_v1 = vmul.f32 %v2567_v63, %v2565_v58 }
 0x528   : > { %v1193_v3 = vpack.c.bf16 %v1192_v1, %v1192_v1 }
 0x52a   : > { %2239 = vmatmul.mubr.msk.bf16.vlgmr.msra.gmra.mrb[4].mxu1 %vm1181_vm1, %v1193_v3  ;;  %v2561_v3 = vld [vmem:[#allocation22 + $0x30] sm:$0xff]  }
 0x52b   : > { %2243 = vmatpush3.bf16.msra.mxu1 %v2516_v2  ;;  %2258 = vmatprep.mubr.msk.bf16.mxu1 %vm3188_vm0, %v3187_v0  ;;  %v2560_v2 = vld [vmem:[#allocation22 + $0x70] sm:$0xff]  }
 0x52c   : > { %2244 = vmatprep.subr.bf16.mxu1 %v3187_v0 }
 0x52f   : > { %2245 = vmatpush3.bf16.msra.mxu1 %v2517_v4  ;;  %v2562_v4 = vld [vmem:[#allocation22 + $0x78] sm:$0xff]  }
 0x530   : > { %2246 = vmatprep.subr.bf16.mxu1 %v3187_v0 }
 0x533   : > { %2247 = vmatpush3.bf16.msra.mxu1 %v2518_v5  ;;  %v2563_v5 = vld [vmem:[#allocation22 + $0x38] sm:$0xff]  }
 0x534   : > { %2248 = vmatprep.subr.bf16.mxu1 %v3187_v0 }
 0x537   : > { %2249 = vmatpush3.bf16.msra.mxu1 %v2519_v6  ;;  %v1402_v6 = vlaneseq }
 0x538   : > { %2250 = vmatprep.subr.bf16.mxu1 %v3187_v0 }
 0x53b   : > { %2251 = vmatpush3.bf16.msra.mxu1 %v2520_v7  ;;  %v1403_v7 = vshrl.u32 %v1402_v6, 7 }
 0x53c   : > { %2252 = vmatprep.subr.bf16.mxu1 %v3187_v0 }
 0x53f   : > { %2253 = vmatpush3.bf16.msra.mxu1 %v2521_v8  ;;  %v1404_v8 = vsub.s32 0, %v1403_v7 }
 0x540   : > { %2254 = vmatprep.subr.bf16.mxu1 %v3187_v0 }
 0x543   : > { %2255 = vmatpush3.bf16.msra.mxu1 %v2522_v10  ;;  %v1400_v10 = vld [vmem:[#allocation21] sm:$0x3] }
 0x544   : > { %2256 = vmatprep.subr.bf16.mxu1 %v3187_v0  ;;  %v2529_v0 = vld [vmem:[#allocation19 + $0x14] ss:$8 sps:$4 sm:$0xff]  }
 0x545   : > { %1494 = vmatprep.subr.bf16.mxu0 %v2529_v0 }
 0x546   : > { %1495 = vmatpush1.bf16.msra.mxu0 %v2527_v26 }
 0x547   : > { %2257 = vmatpush3.bf16.msra.mxu1 %v2523_v11  ;;  %1496 = vmatprep.subr.bf16.mxu0 %v2532_v27  ;;  %v1408_v11 = vsub.s32 1, %v1403_v7 }
 0x548   : > { %2148 = vmatprep.subr.bf16.mxu1 %v2548_v43 }
 0x54a   : > { %1497 = vmatpush1.bf16.msra.mxu0 %v2530_v28 }
 0x54b   : > { %1498 = vmatprep.subr.bf16.mxu0 %v2535_v33 }
 0x5fd   : > { %v1236_v12 = vpop.f32.mrb[4].mxu1 }
 0x5fe   : > { %v1242_v13 = vpack.c.bf16 %v1236_v12, %v1236_v12  ;;  %v2240_v14 = vpop.f32.mrb[5].mxu1  ;;  %v1405_v12 = vrot.slane %v1400_v10, %v1404_v8 }
 0x5ff   : > { %v1239_v15 = vpop.f32.mrb[6].mxu1 }
 0x600   : > { %v2241_v16 = vpop.f32.mrb[7].mxu1  ;;  %2259 = vmatmul.mubr.bf16.vlgmr.msra.gmra.mrb[8].mxu1 %v1242_v13  ;;  %v1409_v13 = vrot.slane %v1400_v10, %v1408_v11 }
 0x601   : > { %2149 = vmatpush3.bf16.msra.mxu1 %v2549_v44 }
 0x602   : > { %2150 = vmatprep.subr.bf16.mxu1 %v2550_v45 }
 0x605   : > { %2151 = vmatpush3.bf16.msra.mxu1 %v2551_v46 }
 0x606   : > { %2152 = vmatprep.subr.bf16.mxu1 %v2552_v47 }
 0x609   : > { %2153 = vmatpush3.bf16.msra.mxu1 %v2553_v48 }
 0x60a   : > { %2154 = vmatprep.subr.bf16.mxu1 %v2554_v49 }
 0x60d   : > { %2155 = vmatpush3.bf16.msra.mxu1 %v2555_v50 }
 0x60e   : > { %2156 = vmatprep.subr.bf16.mxu1 %v2556_v51 }
 0x611   : > { %2157 = vmatpush3.bf16.msra.mxu1 %v2557_v52 }
 0x612   : > { %2158 = vmatprep.subr.bf16.mxu1 %v2558_v53 }
 0x615   : > { %2159 = vmatpush3.bf16.msra.mxu1 %v2559_v54 }
 0x616   : > { %2160 = vmatprep.subr.bf16.mxu1 %v2560_v2 }
 0x619   : > { %2161 = vmatpush3.bf16.msra.mxu1 %v2561_v3 }
 0x61a   : > { %2162 = vmatprep.subr.bf16.mxu1 %v2562_v4 }
 0x61d   : > { %2163 = vmatpush3.bf16.msra.mxu1 %v2563_v5 }
 0x6d3   : > { %v1348_v18 = vpop.f32.mrb[8].mxu1 }
 0x6d4   : > { %v1349_v19 = vadd.f32 %v2058_v17, %v1348_v18  ;;  %v2260_v20 = vpop.f32.mrb[9].mxu1 }
 0x6d5   : > { %v1351_v21 = vpop.f32.mrb[10].mxu1 }
 0x6d6   : > { %v2261_v22 = vpop.f32.mrb[11].mxu1  ;;  %v1354_v23 = vadd.f32 %v1349_v19, %v3795_v9  ;;  %v2533_v9 = vld [vmem:[#allocation19 + $0x30] ss:$8 sps:$4 sm:$0xff]  }
 0x6d7   : > { %1499 = vmatpush1.bf16.msra.mxu0 %v2533_v9 }
 0x6d8   : > { %1355 = vadd.xlane.f32.xlu1 %v1354_v23  ;;  %1500 = vmatprep.subr.bf16.mxu0 %v2538_v34 }
 0x6db   : > { %1501 = vmatpush1.bf16.msra.mxu0 %v2536_v35 }
 0x6dc   : > { %1502 = vmatprep.subr.bf16.mxu0 %v2541_v36 }
 0x6df   : > { %1503 = vmatpush1.bf16.msra.mxu0 %v2539_v37 }
 0x6e0   : > { %1504 = vmatprep.subr.bf16.mxu0 %v2544_v38  ;;  %v2102_v38 = vld [vmem:[#allocation28] ss:$0 sm:$0xff] }
 0x6e3   : > { %1505 = vmatpush1.bf16.msra.mxu0 %v2542_v39 }
 0x6e4   : > { %1506 = vmatprep.subr.bf16.mxu0 %v2547_v40  ;;  %v2103_v40 = vld [vmem:[#allocation30] ss:$0 sm:$0xff] }
 0x6e7   : > { %1507 = vmatpush1.bf16.msra.mxu0 %v2545_v41 }
 0x765   : > { %v1356_v29 = vpop.xlane.xlu1 %1355 }
 0x766   : > { %v1358_v30 = vmul.f32 0.0078125, %v1356_v29 }
 0x768   : > { %v1359_v31 = vsub.f32 %v1354_v23, %v1358_v30 }
 0x76a   : > { %v1360_v32 = vmul.f32 %v1359_v31, %v1359_v31 }
 0x76c   : > { %1361 = vadd.xlane.f32.xlu1 %v1360_v32 }
 0x7f9   : > { %v1362_v55 = vpop.xlane.xlu1 %1361 }
 0x7fa   : > { %v1363_v56 = vmul.f32 0.0078125, %v1362_v55 }
 0x7fc   : > { %v1364_v57 = vadd.f32 1e-05, %v1363_v56 }
 0x7fe   : > { %2568 = vrsqrt.f32 %v1364_v57 }
 0x808   : > { %v2569_v58 = vpop.eup %2568 }
 0x809   : > { %v1366_v60 = vmul.f32 %v2569_v58, %v1359_v31 }
 0x80b   : > { %v1374_v62 = vmul.f32 %v2067_v59, %v1366_v60 }
 0x80d   : > { %v1382_v63 = vadd.f32 %v2068_v61, %v1374_v62 }
 0x80f   : > { %v1383_v1 = vpack.c.bf16 %v1382_v63, %v1382_v63 }
 0x811   : > { %1525 = vmatmul.mubr.bf16.vlgmr.msra.gmra.mrb[12].mxu0 %v1383_v1 }
 0x8e4   : > { %v1526_v14 = vpop.f32.mrb[12].mxu0 }
 0x8e5   : > { %v1527_v15 = vadd.f32 %v1526_v14, %v1405_v12  ;;  %v1528_v16 = vpop.f32.mrb[13].mxu0 }
 0x8e6   : > { %v1529_v17 = vadd.f32 %v1528_v16, %v1409_v13  ;;  %v1530_v18 = vpop.f32.mrb[14].mxu0 }
 0x8e7   : > { %v1533_v19 = vmax.f32 %v1527_v15, 0.0  ;;  %v1531_v20 = vpop.f32.mrb[15].mxu0 }
 0x8e8   : > { %v1534_v21 = vmax.f32 %v1529_v17, 0.0 }
 0x8e9   : > { %v1535_v23 = vpack.c.bf16 %v1533_v19, %v1533_v19 }
 0x8ea   : > { %v1536_v22 = vpack.c.bf16 %v1534_v21, %v1534_v21 }
 0x8ec   : > { %1704 = vmatprep.mubr.bf16.mxu1 %v1536_v22 }
 0x8ed   : > { %1705 = vmatmul.mubr.bf16.vlgmr.msra.gmra.mrb[12].mxu1 %v1535_v23 }
 0x9c0   : > { %v2164_v24 = vpop.f32.mrb[12].mxu1 }
 0x9c1   : > { %v2165_v0 = vpop.f32.mrb[13].mxu1 }
 0x9c2   : > { %v2166_v26 = vadd.f32 %v2165_v0, %v2164_v24  ;;  %v2167_v27 = vpop.f32.mrb[14].mxu1 }
 0x9c3   : > { %v2168_v28 = vpop.f32.mrb[15].mxu1 }
 0x9c4   : > { %v1707_v29 = vadd.f32 %v2166_v26, %v2085_v25 }
 0x9c6   : > { %v1712_v30 = vadd.f32 %v1707_v29, %v1382_v63 }
 0x9c8   : > { %1713 = vadd.xlane.f32.xlu0 %v1712_v30 }
 0xa55   : > { %v1714_v31 = vpop.xlane.xlu0 %1713 }
 0xa56   : > { %v1715_v32 = vmul.f32 0.0078125, %v1714_v31 }
 0xa58   : > { %v1716_v33 = vsub.f32 %v1712_v30, %v1715_v32 }
 0xa5a   : > { %v1717_v9 = vmul.f32 %v1716_v33, %v1716_v33 }
 0xa5c   : > { %1718 = vadd.xlane.f32.xlu1 %v1717_v9 }
 0xae9   : > { %v1719_v34 = vpop.xlane.xlu1 %1718 }
 0xaea   : > { %v1720_v35 = vmul.f32 0.0078125, %v1719_v34 }
 0xaec   : > { %v1721_v36 = vadd.f32 1e-05, %v1720_v35 }
 0xaee   : > { %2570 = vrsqrt.f32 %v1721_v36 }
 0xaf8   : > { %v2571_v37 = vpop.eup %2570 }
 0xaf9   : > { %v1723_v39 = vmul.f32 %v2571_v37, %v1716_v33 }
 0xafb   : > { %v1731_v41 = vmul.f32 %v2102_v38, %v1723_v39 }
 0xafd   : > { %v1739_v42 = vadd.f32 %v2103_v40, %v1731_v41 }
 0xaff   : > { %1740 = vst [vmem:[%s789_s20] sm:$0xff] %v1739_v42 }
 0xb00   : > { %3063 = shalt.err (!%p3060_p8)
}
 0xb01   : > { %s3064_s25 = scalar_lea.hbm %s3848_s27, 128  ;;  %s3068_s20 = scalar_lea.hbm %s3987_s0, 256 }
 0xb02   : > { %p3065_p3 = scmp.ne.s32.totalorder %s3848_s27, %s3064_s25  ;;  %p3069_p13 = scmp.lt.u32.totalorder %s3848_s27, %s3987_s0 }
 0xb03   : > { %p3070_p12 = scmp.lt.u32.totalorder %s3068_s20, %s3064_s25  ;;  %p3072_p2 = scmp.lt.u32.totalorder %s3064_s25, %s3848_s27 }
 0xb04   : > { %p3066_p11 = pnand %p3065_p3, %p3988_p9 }
 0xb05   : > { %p3071_p4 = por %p3070_p12, %p3069_p13 }
 0xb06   : > { %p3067_p6 = pneg %p3066_p11 }
 0xb07   : > { %p3073_p10 = por %p3072_p2, %p3071_p4 }
 0xb09   : > { %p3074_p1 = pnand %p3073_p10, %p3067_p6 }
 0xb0b   : > { %3077 = shalt.err (!%p3074_p1)
}
 0xb0c   : > { %2328 = dma.vmem_to_hbm [thread:$0]  (%p3988_p9), %s3850_s21, 128, %s3848_s27, %s1742_s23  }
 0xb0d PF: > { %s3989_s28 = sld [smem:[#allocation42_spill]]  ;;  %s3990_s30 = sld [smem:[#allocation47_spill]] }
 0xb0e   : > { %p3991_p0 = scmp.ne.s32.totalorder %s3976_s17, 0 }
 0xb13   : > { %s1768_s26 = sand.u32 1, %s3989_s28   ;;  %p3992_p7 = scmp.ge.s32.totalorder %s3990_s30, 2 }
 0xb14   : > { %s1769_s19 = scalar_lea.sflag [#allocation6], %s1768_s26 }
 0xb15   : > { %p2384_p5 = pnand %p3992_p7, %p3991_p0 }
 0xb17   : > { %3139 = dma.done.wait (!%p2384_p5), %s1769_s19, 128  }
 0xb18   : > { %3141 = vsyncadd (!%p2384_p5), %s1769_s19, 4294967168  ;;  %s41_s4 = sadd.s32 1, %s3990_s30   ;;  %s3993_s24 = sld [smem:[#allocation43_spill]] }
 0xb19   : > { %p38_p8 = scmp.ge.s32.totalorder %s41_s4, 4   ;;  %s3994_s25 = sld [smem:[#allocation44_spill]] }
 0xb1a   : > { %s3995_s27 = sld [smem:[#allocation46_spill]]  ;;  %s3996_s26 = smov %s3688_s29 }
 0xb1b   : > { %s3997_s28 = smov %s4000_s3  ;;  %s3998_s29 = smov %s41_s4 }
 0xb1c   :  { %40 = sbr.rel (!%p38_p8) target bundleno = 23 (0x17), region = 202 }
 0xb23   :  { %1774 = vsyncpa [#allocation5], 1 }
 0xb24   :  { %1776 = vsyncpa [#allocation5 + $0x1], 1 }
 0xb25   :  { %1777 = vsyncpa [#allocation8], 1 }
 0xb26   :  { %1778 = vsyncpa [#allocation11], 1 }
 0xb27   :  { %1779 = vsyncpa [#allocation14], 1 }
 0xb28   :  { %1780 = vsyncpa [#allocation17], 1 }
 0xb29   :  { %1781 = vsyncpa [#allocation20], 1 }
 0xb2a   :  { %1782 = vsyncpa [#allocation23], 1 }
 0xb2b   :  { %1783 = vsyncpa [#allocation26], 1 }
 0xb2c   :  { %1784 = vsyncpa [#allocation29], 1 }
 0xb2d   :  { %1785 = vsyncpa [#allocation6], 1 }
 0xb2e   :  { %1787 = vsyncpa [#allocation6 + $0x1], 1 }

</bundles_post_ra>
